<compile_context>
chip_gen: v7x
topology: tpu7x:2x2x1
jax: 0.10.0
libtpu: 0.0.40
codegen_flags: <defaults>
</compile_context>

<pallas_src>
import functools
import math

import jax
import jax.numpy as jnp
from jax.experimental import pallas as pl
from jax.experimental.pallas import tpu as pltpu


# -----------------------------------------------------------------------------
# Pallas kernel: full OmniAnomaly forward for one batch block (time-major).
# -----------------------------------------------------------------------------
def _omni_kernel(
    # inputs (time-major)
    x_ref,       # (S, Bb, I)   f32
    eps_ref,     # (S, Bb, L)   f32
    # encoder LSTM weights (right-multiply layout; i/f/o columns pre-scaled by 0.5)
    wx_e_ref,    # (I, 4H)      f32 if I==1 (VPU path) else bf16
    wh_e_ref,    # (H, 4H)      bf16
    b_e_ref,     # (1, 4H)      f32  (= b_ih + b_hh)
    # fused fc_mu | fc_logvar
    wmulv_ref,   # (H, 2L)      bf16
    bmulv_ref,   # (1, 2L)      f32
    # decoder LSTM weights (i/f/o columns pre-scaled by 0.5)
    wx_d_ref,    # (L, 4H)      bf16
    wh_d_ref,    # (H, 4H)      bf16
    b_d_ref,     # (1, 4H)      f32
    # fc_out
    wout_ref,    # (1, H) f32 if I==1 (VPU path) else (H, I) bf16
    bout_ref,    # (1, I)       f32
    # outputs
    recon_ref,   # (S, Bb, I)   f32
    mulv_ref,    # (S, Bb, 2L)  f32   [mu | logvar]
    *, S, Bb, H, L, I,
):
    f32 = jnp.float32
    bf16 = jnp.bfloat16

    def cell(gx_t, h, c, wh):
        # gx_t already holds x_t @ Wx + (b_ih + b_hh) with i/f/o pre-scaled by
        # 0.5; only the h-dependent matmul sits on the serial chain.
        # PyTorch gate order: i, f, g, o.
        gates = gx_t + jnp.dot(h.astype(bf16), wh, preferred_element_type=f32)
        t = jnp.tanh(gates)                       # single full-vreg EUP transcendental
        i_g = 0.5 * (1.0 + t[:, 0 * H:1 * H])     # sigmoid(a) = 0.5*(1+tanh(a/2)) (VPU)
        f_g = 0.5 * (1.0 + t[:, 1 * H:2 * H])
        g_g = t[:, 2 * H:3 * H]                   # g column was NOT pre-scaled
        o_g = 0.5 * (1.0 + t[:, 3 * H:4 * H])
        c_new = f_g * c + i_g * g_g
        h_new = o_g * jnp.tanh(c_new)
        return h_new, c_new

    # ---------------- encoder: hoisted input projection + recurrence ----------
    if I == 1:
        # K=1 matmul replaced by a VPU broadcast-multiply (no MXU pass).
        gx_e = x_ref[...] * wx_e_ref[...] + b_e_ref[...]            # (S, Bb, 4H)
    else:
        x2 = x_ref[...].reshape(S * Bb, I).astype(bf16)
        gx_e = (jnp.dot(x2, wx_e_ref[...], preferred_element_type=f32)
                + b_e_ref[...]).reshape(S, Bb, 4 * H)
    wh_e = wh_e_ref[...]

    h = jnp.zeros((Bb, H), f32)
    c = jnp.zeros((Bb, H), f32)
    hs_enc = []
    # S is static & small -> full static unroll gives the scheduler
    # cross-timestep visibility; all slices are static & tile-aligned.
    for t in range(S):
        h, c = cell(gx_e[t], h, c, wh_e)
        hs_enc.append(h)
    enc = jnp.concatenate(hs_enc, axis=0)                           # (S*Bb, H), regs

    # ---------------- fused fc_mu|fc_logvar + reparameterize ------------------
    mulv = (jnp.dot(enc.astype(bf16), wmulv_ref[...],
                    preferred_element_type=f32) + bmulv_ref[...])   # (S*Bb, 2L)
    mulv_ref[...] = mulv.reshape(S, Bb, 2 * L)                      # one store
    mu = mulv[:, :L]
    logvar = mulv[:, L:]
    eps = eps_ref[...].reshape(S * Bb, L)
    z = mu + eps * jnp.exp(0.5 * logvar)                            # (S*Bb, L)

    # ---------------- decoder: hoisted input projection + recurrence ----------
    gx_d = (jnp.dot(z.astype(bf16), wx_d_ref[...],
                    preferred_element_type=f32) + b_d_ref[...])     # (S*Bb, 4H)
    wh_d = wh_d_ref[...]

    h = jnp.zeros((Bb, H), f32)
    c = jnp.zeros((Bb, H), f32)
    hs_dec = []
    for t in range(S):
        h, c = cell(gx_d[t * Bb:(t + 1) * Bb, :], h, c, wh_d)
        hs_dec.append(h)
    dec = jnp.concatenate(hs_dec, axis=0)                           # (S*Bb, H)

    # ---------------- fc_out hoisted out of the loop ---------------------------
    if I == 1:
        # N=1 matmul replaced by VPU multiply + lane reduction.
        rec = (jnp.sum(dec * wout_ref[...], axis=-1, keepdims=True)
               + bout_ref[...])                                     # (S*Bb, 1)
    else:
        rec = (jnp.dot(dec.astype(bf16), wout_ref[...],
                       preferred_element_type=f32) + bout_ref[...])
    recon_ref[...] = rec.reshape(S, Bb, I)


# -----------------------------------------------------------------------------
# Parameter construction (deterministic, mirrors nn.LSTM / nn.Linear shapes).
# All params stored in f32 with UNSCALED gates; the wrapper does the 0.5
# pre-scaling of the i/f/o gate columns and the bf16 casts.
# -----------------------------------------------------------------------------
def init_params(key, input_size=1, hidden_size=32, latent_dim=16):
    H, I, L = hidden_size, input_size, latent_dim
    ks = jax.random.split(key, 16)

    def unif(k, shape, bound):
        return jax.random.uniform(k, shape, jnp.float32, -bound, bound)

    k_lstm = 1.0 / math.sqrt(H)
    w_ih_e = unif(ks[0], (4 * H, I), k_lstm)
    w_hh_e = unif(ks[1], (4 * H, H), k_lstm)
    b_e = unif(ks[2], (4 * H,), k_lstm) + unif(ks[3], (4 * H,), k_lstm)
    k_fc = 1.0 / math.sqrt(H)
    w_mu = unif(ks[4], (L, H), k_fc)
    b_mu = unif(ks[5], (L,), k_fc)
    w_lv = unif(ks[6], (L, H), k_fc)
    b_lv = unif(ks[7], (L,), k_fc)
    w_ih_d = unif(ks[8], (4 * H, L), k_lstm)
    w_hh_d = unif(ks[9], (4 * H, H), k_lstm)
    b_d = unif(ks[10], (4 * H,), k_lstm) + unif(ks[11], (4 * H,), k_lstm)
    w_out = unif(ks[12], (I, H), k_fc)
    b_out = unif(ks[13], (I,), k_fc)

    return dict(
        wx_e=w_ih_e.T,                                        # (I, 4H)
        wh_e=w_hh_e.T,                                        # (H, 4H)
        b_e=b_e.reshape(1, 4 * H),
        wmulv=jnp.concatenate([w_mu.T, w_lv.T], axis=1),      # (H, 2L)
        bmulv=jnp.concatenate([b_mu, b_lv]).reshape(1, 2 * L),
        wx_d=w_ih_d.T,                                        # (L, 4H)
        wh_d=w_hh_d.T,                                        # (H, 4H)
        b_d=b_d.reshape(1, 4 * H),
        wout=w_out.T,                                         # (H, I)
        bout=b_out.reshape(1, I),
    )


def _prep_weights(params, H, I):
    """Pre-scale i/f/o gate columns by 0.5 (single-tanh trick) and cast for MXU."""
    def scale_ifo(a):  # a: (..., 4H); scaling by 0.5 is exact (power of two)
        return jnp.concatenate(
            [a[..., :2 * H] * 0.5, a[..., 2 * H:3 * H], a[..., 3 * H:] * 0.5],
            axis=-1)

    bf16 = jnp.bfloat16
    wx_e = scale_ifo(params["wx_e"])
    wh_e = scale_ifo(params["wh_e"]).astype(bf16)
    b_e = scale_ifo(params["b_e"])
    wmulv = params["wmulv"].astype(bf16)
    bmulv = params["bmulv"]
    wx_d = scale_ifo(params["wx_d"]).astype(bf16)
    wh_d = scale_ifo(params["wh_d"]).astype(bf16)
    b_d = scale_ifo(params["b_d"])
    if I == 1:
        # VPU paths keep f32 (no MXU, so no benefit to bf16 casts).
        wout = params["wout"].T                               # (1, H) f32
    else:
        wx_e = wx_e.astype(bf16)                              # (I, 4H) bf16
        wout = params["wout"].astype(bf16)                    # (H, I) bf16
    bout = params["bout"]
    return [wx_e, wh_e, b_e, wmulv, bmulv, wx_d, wh_d, b_d, wout, bout]


# -----------------------------------------------------------------------------
# Wrapper: batch-first in / batch-first out, batch-blocked pallas_call.
# -----------------------------------------------------------------------------
@functools.partial(jax.jit, static_argnames=("hidden_size", "latent_dim"))
def omni_anomaly_forward(x, eps, params, hidden_size=32, latent_dim=16):
    B, S, I = x.shape
    H, L = hidden_size, latent_dim

    # Batch blocking: Bb rows per grid step (multiple of 8 sublanes, capped at
    # 256 to fill an MXU pass per recurrence step). Grid axis is "parallel" so
    # v7x can shard blocks across its two TensorCores; it also bounds per-block
    # VMEM residency for large batches.
    Bb = min(256, ((B + 7) // 8) * 8)
    nb = -(-B // Bb)
    Bp = nb * Bb

    # Time-major (S, Bp, .) layout: each timestep's batch block is a contiguous,
    # tile-aligned slab.
    x_tm = jnp.transpose(x, (1, 0, 2)).astype(jnp.float32)          # (S, B, I)
    eps_tm = jnp.transpose(eps, (1, 0, 2)).astype(jnp.float32)      # (S, B, L)
    if Bp != B:
        x_tm = jnp.pad(x_tm, ((0, 0), (0, Bp - B), (0, 0)))
        eps_tm = jnp.pad(eps_tm, ((0, 0), (0, Bp - B), (0, 0)))

    weights = _prep_weights(params, H, I)
    kernel = functools.partial(_omni_kernel, S=S, Bb=Bb, H=H, L=L, I=I)

    def batch_spec(last):
        return pl.BlockSpec((S, Bb, last), lambda b: (0, b, 0))

    def full_spec(arr):
        shp = arr.shape
        return pl.BlockSpec(shp, lambda b: (0,) * len(shp))

    recon_tm, mulv_tm = pl.pallas_call(
        kernel,
        out_shape=(
            jax.ShapeDtypeStruct((S, Bp, I), jnp.float32),
            jax.ShapeDtypeStruct((S, Bp, 2 * L), jnp.float32),
        ),
        grid=(nb,),
        in_specs=[batch_spec(I), batch_spec(L)] + [full_spec(w) for w in weights],
        out_specs=(batch_spec(I), batch_spec(2 * L)),
        compiler_params=pltpu.CompilerParams(
            dimension_semantics=("parallel",)),
    )(x_tm, eps_tm, *weights)

    recon = jnp.transpose(recon_tm[:, :B], (1, 0, 2))               # (B, S, I)
    mulv = jnp.transpose(mulv_tm[:, :B], (1, 0, 2))                 # (B, S, 2L)
    return recon, mulv[..., :L], mulv[..., L:]


# -----------------------------------------------------------------------------
# Pure-JAX f32 reference (mirrors the PyTorch module) for a sanity check.
# Uses the UNSCALED params and standard sigmoid/tanh gates.
# -----------------------------------------------------------------------------
def reference_forward(x, eps, params, hidden_size=32, latent_dim=16):
    B, S, _ = x.shape
    H, L = hidden_size, latent_dim

    def lstm(seq, wx, wh, b):
        h = jnp.zeros((B, H), jnp.float32)
        c = jnp.zeros((B, H), jnp.float32)
        outs = []
        for t in range(S):
            g = seq[:, t] @ wx + h @ wh + b
            i = jax.nn.sigmoid(g[:, :H])
            f = jax.nn.sigmoid(g[:, H:2 * H])
            gg = jnp.tanh(g[:, 2 * H:3 * H])
            o = jax.nn.sigmoid(g[:, 3 * H:])
            c = f * c + i * gg
            h = o * jnp.tanh(c)
            outs.append(h)
        return jnp.stack(outs, axis=1)

    enc = lstm(x.astype(jnp.float32), params["wx_e"], params["wh_e"], params["b_e"])
    mulv = enc @ params["wmulv"] + params["bmulv"]
    mu, logvar = mulv[..., :L], mulv[..., L:]
    z = mu + eps * jnp.exp(0.5 * logvar)
    dec = lstm(z, params["wx_d"], params["wh_d"], params["b_d"])
    recon = dec @ params["wout"] + params["bout"]
    return recon, mu, logvar


if __name__ == "__main__":
    input_size, hidden_size, latent_dim = 1, 32, 16
    batch, seq = 2, 8

    root = jax.random.PRNGKey(0)
    k_x, k_eps, k_par = jax.random.split(root, 3)

    x = jax.random.normal(k_x, (batch, seq, input_size), jnp.float32)
    # torch.randn_like(std) equivalent: standard-normal noise supplied as input.
    eps = jax.random.normal(k_eps, (batch, seq, latent_dim), jnp.float32)
    params = init_params(k_par, input_size, hidden_size, latent_dim)

    recon, mu, logvar = omni_anomaly_forward(
        x, eps, params, hidden_size=hidden_size, latent_dim=latent_dim
    )
    jax.block_until_ready((recon, mu, logvar))

    assert recon.shape == (batch, seq, input_size)
    assert mu.shape == (batch, seq, latent_dim)
    assert logvar.shape == (batch, seq, latent_dim)
    assert bool(jnp.all(jnp.isfinite(recon)))
    assert bool(jnp.all(jnp.isfinite(mu)))
    assert bool(jnp.all(jnp.isfinite(logvar)))

    # Sanity-check against the pure-JAX f32 reference (loose tolerance because
    # the kernel uses bf16 operands on the recurrent / projection matmuls).
    r_ref, m_ref, lv_ref = reference_forward(
        x, eps, params, hidden_size=hidden_size, latent_dim=latent_dim
    )
    assert bool(jnp.allclose(mu, m_ref, atol=5e-2, rtol=5e-2))
    assert bool(jnp.allclose(logvar, lv_ref, atol=5e-2, rtol=5e-2))
    assert bool(jnp.allclose(recon, r_ref, atol=5e-2, rtol=5e-2))

    print("KERNEL_OK")
</pallas_src>

<mosaic_0001>
module attributes {stable_mosaic.version = 11 : i64} {
  func.func @_omni_kernel(%arg0: i32, %arg1: memref<8x8x1xf32, #tpu.memory_space<vmem>>, %arg2: memref<8x8x16xf32, #tpu.memory_space<vmem>>, %arg3: memref<1x128xf32, #tpu.memory_space<vmem>>, %arg4: memref<32x128xbf16, #tpu.memory_space<vmem>>, %arg5: memref<1x128xf32, #tpu.memory_space<vmem>>, %arg6: memref<32x32xbf16, #tpu.memory_space<vmem>>, %arg7: memref<1x32xf32, #tpu.memory_space<vmem>>, %arg8: memref<16x128xbf16, #tpu.memory_space<vmem>>, %arg9: memref<32x128xbf16, #tpu.memory_space<vmem>>, %arg10: memref<1x128xf32, #tpu.memory_space<vmem>>, %arg11: memref<1x32xf32, #tpu.memory_space<vmem>>, %arg12: memref<1x1xf32, #tpu.memory_space<vmem>>, %arg13: memref<8x8x1xf32, #tpu.memory_space<vmem>>, %arg14: memref<8x8x32xf32, #tpu.memory_space<vmem>>) attributes {dimension_semantics = [#tpu.dimension_semantics<parallel>], iteration_bounds = array<i64: 1>, scalar_prefetch = 0 : i64, scratch_operands = 0 : i64, tpu.core_type = #tpu.core_type<tc>, window_params = [{transform_indices = @transform_0, window_bounds = array<i64: 8, 8, 1>}, {transform_indices = @transform_1, window_bounds = array<i64: 8, 8, 16>}, {pipeline_mode = #tpu.pipeline_mode<synchronous>, transform_indices = @transform_2, window_bounds = array<i64: 1, 128>}, {pipeline_mode = #tpu.pipeline_mode<synchronous>, transform_indices = @transform_3, window_bounds = array<i64: 32, 128>}, {pipeline_mode = #tpu.pipeline_mode<synchronous>, transform_indices = @transform_4, window_bounds = array<i64: 1, 128>}, {pipeline_mode = #tpu.pipeline_mode<synchronous>, transform_indices = @transform_5, window_bounds = array<i64: 32, 32>}, {pipeline_mode = #tpu.pipeline_mode<synchronous>, transform_indices = @transform_6, window_bounds = array<i64: 1, 32>}, {pipeline_mode = #tpu.pipeline_mode<synchronous>, transform_indices = @transform_7, window_bounds = array<i64: 16, 128>}, {pipeline_mode = #tpu.pipeline_mode<synchronous>, transform_indices = @transform_8, window_bounds = array<i64: 32, 128>}, {pipeline_mode = #tpu.pipeline_mode<synchronous>, transform_indices = @transform_9, window_bounds = array<i64: 1, 128>}, {pipeline_mode = #tpu.pipeline_mode<synchronous>, transform_indices = @transform_10, window_bounds = array<i64: 1, 32>}, {pipeline_mode = #tpu.pipeline_mode<synchronous>, transform_indices = @transform_11, window_bounds = array<i64: 1, 1>}, {transform_indices = @transform_12, window_bounds = array<i64: 8, 8, 1>}, {transform_indices = @transform_13, window_bounds = array<i64: 8, 8, 32>}]} {
    %c0 = arith.constant 0 : index
    %c0_0 = arith.constant 0 : index
    %c0_1 = arith.constant 0 : index
    %0 = vector.load %arg1[%c0, %c0_0, %c0_1] : memref<8x8x1xf32, #tpu.memory_space<vmem>>, vector<8x8x1xf32>
    %c0_2 = arith.constant 0 : index
    %c0_3 = arith.constant 0 : index
    %1 = vector.load %arg3[%c0_2, %c0_3] : memref<1x128xf32, #tpu.memory_space<vmem>>, vector<1x128xf32>
    %2 = vector.shape_cast %1 : vector<1x128xf32> to vector<1x1x128xf32>
    %3 = vector.broadcast %0 : vector<8x8x1xf32> to vector<8x8x128xf32>
    %4 = vector.broadcast %2 : vector<1x1x128xf32> to vector<8x8x128xf32>
    %5 = arith.mulf %3, %4 : vector<8x8x128xf32>
    %c0_4 = arith.constant 0 : index
    %c0_5 = arith.constant 0 : index
    %6 = vector.load %arg5[%c0_4, %c0_5] : memref<1x128xf32, #tpu.memory_space<vmem>>, vector<1x128xf32>
    %7 = vector.shape_cast %6 : vector<1x128xf32> to vector<1x1x128xf32>
    %8 = vector.broadcast %7 : vector<1x1x128xf32> to vector<8x8x128xf32>
    %9 = arith.addf %5, %8 : vector<8x8x128xf32>
    %c0_6 = arith.constant 0 : index
    %c0_7 = arith.constant 0 : index
    %10 = vector.load %arg4[%c0_6, %c0_7] : memref<32x128xbf16, #tpu.memory_space<vmem>>, vector<32x128xbf16>
    %cst = arith.constant 0.000000e+00 : f32
    %11 = vector.broadcast %cst : f32 to vector<8x32xf32>
    %cst_8 = arith.constant 0.000000e+00 : f32
    %12 = vector.broadcast %cst_8 : f32 to vector<8x32xf32>
    %13 = vector.extract_strided_slice %9 {offsets = [0, 0, 0], sizes = [1, 8, 128], strides = [1, 1, 1]} : vector<8x8x128xf32> to vector<1x8x128xf32>
    %14 = vector.shape_cast %13 : vector<1x8x128xf32> to vector<8x128xf32>
    %15 = arith.truncf %11 : vector<8x32xf32> to vector<8x32xbf16>
    %cst_9 = arith.constant dense<0.000000e+00> : vector<8x128xf32>
    %16 = tpu.matmul %15, %10, %cst_9 {dimension_numbers = #tpu.dot_dimension_numbers<[1], [0], [0], [1], [0, 0, 1, 1], [], []>} : vector<8x32xbf16>, vector<32x128xbf16>, vector<8x128xf32> -> vector<8x128xf32>
    %17 = arith.addf %14, %16 : vector<8x128xf32>
    %18 = math.tanh %17 : vector<8x128xf32>
    %19 = vector.extract_strided_slice %18 {offsets = [0, 0], sizes = [8, 32], strides = [1, 1]} : vector<8x128xf32> to vector<8x32xf32>
    %cst_10 = arith.constant 1.000000e+00 : f32
    %20 = vector.broadcast %cst_10 : f32 to vector<8x32xf32>
    %21 = arith.addf %20, %19 : vector<8x32xf32>
    %cst_11 = arith.constant 5.000000e-01 : f32
    %22 = vector.broadcast %cst_11 : f32 to vector<8x32xf32>
    %23 = arith.mulf %22, %21 : vector<8x32xf32>
    %24 = vector.extract_strided_slice %18 {offsets = [0, 32], sizes = [8, 32], strides = [1, 1]} : vector<8x128xf32> to vector<8x32xf32>
    %cst_12 = arith.constant 1.000000e+00 : f32
    %25 = vector.broadcast %cst_12 : f32 to vector<8x32xf32>
    %26 = arith.addf %25, %24 : vector<8x32xf32>
    %cst_13 = arith.constant 5.000000e-01 : f32
    %27 = vector.broadcast %cst_13 : f32 to vector<8x32xf32>
    %28 = arith.mulf %27, %26 : vector<8x32xf32>
    %29 = vector.extract_strided_slice %18 {offsets = [0, 64], sizes = [8, 32], strides = [1, 1]} : vector<8x128xf32> to vector<8x32xf32>
    %30 = vector.extract_strided_slice %18 {offsets = [0, 96], sizes = [8, 32], strides = [1, 1]} : vector<8x128xf32> to vector<8x32xf32>
    %cst_14 = arith.constant 1.000000e+00 : f32
    %31 = vector.broadcast %cst_14 : f32 to vector<8x32xf32>
    %32 = arith.addf %31, %30 : vector<8x32xf32>
    %cst_15 = arith.constant 5.000000e-01 : f32
    %33 = vector.broadcast %cst_15 : f32 to vector<8x32xf32>
    %34 = arith.mulf %33, %32 : vector<8x32xf32>
    %35 = arith.mulf %28, %12 : vector<8x32xf32>
    %36 = arith.mulf %23, %29 : vector<8x32xf32>
    %37 = arith.addf %35, %36 : vector<8x32xf32>
    %38 = math.tanh %37 : vector<8x32xf32>
    %39 = arith.mulf %34, %38 : vector<8x32xf32>
    %40 = vector.extract_strided_slice %9 {offsets = [1, 0, 0], sizes = [1, 8, 128], strides = [1, 1, 1]} : vector<8x8x128xf32> to vector<1x8x128xf32>
    %41 = vector.shape_cast %40 : vector<1x8x128xf32> to vector<8x128xf32>
    %42 = arith.truncf %39 : vector<8x32xf32> to vector<8x32xbf16>
    %cst_16 = arith.constant dense<0.000000e+00> : vector<8x128xf32>
    %43 = tpu.matmul %42, %10, %cst_16 {dimension_numbers = #tpu.dot_dimension_numbers<[1], [0], [0], [1], [0, 0, 1, 1], [], []>} : vector<8x32xbf16>, vector<32x128xbf16>, vector<8x128xf32> -> vector<8x128xf32>
    %44 = arith.addf %41, %43 : vector<8x128xf32>
    %45 = math.tanh %44 : vector<8x128xf32>
    %46 = vector.extract_strided_slice %45 {offsets = [0, 0], sizes = [8, 32], strides = [1, 1]} : vector<8x128xf32> to vector<8x32xf32>
    %cst_17 = arith.constant 1.000000e+00 : f32
    %47 = vector.broadcast %cst_17 : f32 to vector<8x32xf32>
    %48 = arith.addf %47, %46 : vector<8x32xf32>
    %cst_18 = arith.constant 5.000000e-01 : f32
    %49 = vector.broadcast %cst_18 : f32 to vector<8x32xf32>
    %50 = arith.mulf %49, %48 : vector<8x32xf32>
    %51 = vector.extract_strided_slice %45 {offsets = [0, 32], sizes = [8, 32], strides = [1, 1]} : vector<8x128xf32> to vector<8x32xf32>
    %cst_19 = arith.constant 1.000000e+00 : f32
    %52 = vector.broadcast %cst_19 : f32 to vector<8x32xf32>
    %53 = arith.addf %52, %51 : vector<8x32xf32>
    %cst_20 = arith.constant 5.000000e-01 : f32
    %54 = vector.broadcast %cst_20 : f32 to vector<8x32xf32>
    %55 = arith.mulf %54, %53 : vector<8x32xf32>
    %56 = vector.extract_strided_slice %45 {offsets = [0, 64], sizes = [8, 32], strides = [1, 1]} : vector<8x128xf32> to vector<8x32xf32>
    %57 = vector.extract_strided_slice %45 {offsets = [0, 96], sizes = [8, 32], strides = [1, 1]} : vector<8x128xf32> to vector<8x32xf32>
    %cst_21 = arith.constant 1.000000e+00 : f32
    %58 = vector.broadcast %cst_21 : f32 to vector<8x32xf32>
    %59 = arith.addf %58, %57 : vector<8x32xf32>
    %cst_22 = arith.constant 5.000000e-01 : f32
    %60 = vector.broadcast %cst_22 : f32 to vector<8x32xf32>
    %61 = arith.mulf %60, %59 : vector<8x32xf32>
    %62 = arith.mulf %55, %37 : vector<8x32xf32>
    %63 = arith.mulf %50, %56 : vector<8x32xf32>
    %64 = arith.addf %62, %63 : vector<8x32xf32>
    %65 = math.tanh %64 : vector<8x32xf32>
    %66 = arith.mulf %61, %65 : vector<8x32xf32>
    %67 = vector.extract_strided_slice %9 {offsets = [2, 0, 0], sizes = [1, 8, 128], strides = [1, 1, 1]} : vector<8x8x128xf32> to vector<1x8x128xf32>
    %68 = vector.shape_cast %67 : vector<1x8x128xf32> to vector<8x128xf32>
    %69 = arith.truncf %66 : vector<8x32xf32> to vector<8x32xbf16>
    %cst_23 = arith.constant dense<0.000000e+00> : vector<8x128xf32>
    %70 = tpu.matmul %69, %10, %cst_23 {dimension_numbers = #tpu.dot_dimension_numbers<[1], [0], [0], [1], [0, 0, 1, 1], [], []>} : vector<8x32xbf16>, vector<32x128xbf16>, vector<8x128xf32> -> vector<8x128xf32>
    %71 = arith.addf %68, %70 : vector<8x128xf32>
    %72 = math.tanh %71 : vector<8x128xf32>
    %73 = vector.extract_strided_slice %72 {offsets = [0, 0], sizes = [8, 32], strides = [1, 1]} : vector<8x128xf32> to vector<8x32xf32>
    %cst_24 = arith.constant 1.000000e+00 : f32
    %74 = vector.broadcast %cst_24 : f32 to vector<8x32xf32>
    %75 = arith.addf %74, %73 : vector<8x32xf32>
    %cst_25 = arith.constant 5.000000e-01 : f32
    %76 = vector.broadcast %cst_25 : f32 to vector<8x32xf32>
    %77 = arith.mulf %76, %75 : vector<8x32xf32>
    %78 = vector.extract_strided_slice %72 {offsets = [0, 32], sizes = [8, 32], strides = [1, 1]} : vector<8x128xf32> to vector<8x32xf32>
    %cst_26 = arith.constant 1.000000e+00 : f32
    %79 = vector.broadcast %cst_26 : f32 to vector<8x32xf32>
    %80 = arith.addf %79, %78 : vector<8x32xf32>
    %cst_27 = arith.constant 5.000000e-01 : f32
    %81 = vector.broadcast %cst_27 : f32 to vector<8x32xf32>
    %82 = arith.mulf %81, %80 : vector<8x32xf32>
    %83 = vector.extract_strided_slice %72 {offsets = [0, 64], sizes = [8, 32], strides = [1, 1]} : vector<8x128xf32> to vector<8x32xf32>
    %84 = vector.extract_strided_slice %72 {offsets = [0, 96], sizes = [8, 32], strides = [1, 1]} : vector<8x128xf32> to vector<8x32xf32>
    %cst_28 = arith.constant 1.000000e+00 : f32
    %85 = vector.broadcast %cst_28 : f32 to vector<8x32xf32>
    %86 = arith.addf %85, %84 : vector<8x32xf32>
    %cst_29 = arith.constant 5.000000e-01 : f32
    %87 = vector.broadcast %cst_29 : f32 to vector<8x32xf32>
    %88 = arith.mulf %87, %86 : vector<8x32xf32>
    %89 = arith.mulf %82, %64 : vector<8x32xf32>
    %90 = arith.mulf %77, %83 : vector<8x32xf32>
    %91 = arith.addf %89, %90 : vector<8x32xf32>
    %92 = math.tanh %91 : vector<8x32xf32>
    %93 = arith.mulf %88, %92 : vector<8x32xf32>
    %94 = vector.extract_strided_slice %9 {offsets = [3, 0, 0], sizes = [1, 8, 128], strides = [1, 1, 1]} : vector<8x8x128xf32> to vector<1x8x128xf32>
    %95 = vector.shape_cast %94 : vector<1x8x128xf32> to vector<8x128xf32>
    %96 = arith.truncf %93 : vector<8x32xf32> to vector<8x32xbf16>
    %cst_30 = arith.constant dense<0.000000e+00> : vector<8x128xf32>
    %97 = tpu.matmul %96, %10, %cst_30 {dimension_numbers = #tpu.dot_dimension_numbers<[1], [0], [0], [1], [0, 0, 1, 1], [], []>} : vector<8x32xbf16>, vector<32x128xbf16>, vector<8x128xf32> -> vector<8x128xf32>
    %98 = arith.addf %95, %97 : vector<8x128xf32>
    %99 = math.tanh %98 : vector<8x128xf32>
    %100 = vector.extract_strided_slice %99 {offsets = [0, 0], sizes = [8, 32], strides = [1, 1]} : vector<8x128xf32> to vector<8x32xf32>
    %cst_31 = arith.constant 1.000000e+00 : f32
    %101 = vector.broadcast %cst_31 : f32 to vector<8x32xf32>
    %102 = arith.addf %101, %100 : vector<8x32xf32>
    %cst_32 = arith.constant 5.000000e-01 : f32
    %103 = vector.broadcast %cst_32 : f32 to vector<8x32xf32>
    %104 = arith.mulf %103, %102 : vector<8x32xf32>
    %105 = vector.extract_strided_slice %99 {offsets = [0, 32], sizes = [8, 32], strides = [1, 1]} : vector<8x128xf32> to vector<8x32xf32>
    %cst_33 = arith.constant 1.000000e+00 : f32
    %106 = vector.broadcast %cst_33 : f32 to vector<8x32xf32>
    %107 = arith.addf %106, %105 : vector<8x32xf32>
    %cst_34 = arith.constant 5.000000e-01 : f32
    %108 = vector.broadcast %cst_34 : f32 to vector<8x32xf32>
    %109 = arith.mulf %108, %107 : vector<8x32xf32>
    %110 = vector.extract_strided_slice %99 {offsets = [0, 64], sizes = [8, 32], strides = [1, 1]} : vector<8x128xf32> to vector<8x32xf32>
    %111 = vector.extract_strided_slice %99 {offsets = [0, 96], sizes = [8, 32], strides = [1, 1]} : vector<8x128xf32> to vector<8x32xf32>
    %cst_35 = arith.constant 1.000000e+00 : f32
    %112 = vector.broadcast %cst_35 : f32 to vector<8x32xf32>
    %113 = arith.addf %112, %111 : vector<8x32xf32>
    %cst_36 = arith.constant 5.000000e-01 : f32
    %114 = vector.broadcast %cst_36 : f32 to vector<8x32xf32>
    %115 = arith.mulf %114, %113 : vector<8x32xf32>
    %116 = arith.mulf %109, %91 : vector<8x32xf32>
    %117 = arith.mulf %104, %110 : vector<8x32xf32>
    %118 = arith.addf %116, %117 : vector<8x32xf32>
    %119 = math.tanh %118 : vector<8x32xf32>
    %120 = arith.mulf %115, %119 : vector<8x32xf32>
    %121 = vector.extract_strided_slice %9 {offsets = [4, 0, 0], sizes = [1, 8, 128], strides = [1, 1, 1]} : vector<8x8x128xf32> to vector<1x8x128xf32>
    %122 = vector.shape_cast %121 : vector<1x8x128xf32> to vector<8x128xf32>
    %123 = arith.truncf %120 : vector<8x32xf32> to vector<8x32xbf16>
    %cst_37 = arith.constant dense<0.000000e+00> : vector<8x128xf32>
    %124 = tpu.matmul %123, %10, %cst_37 {dimension_numbers = #tpu.dot_dimension_numbers<[1], [0], [0], [1], [0, 0, 1, 1], [], []>} : vector<8x32xbf16>, vector<32x128xbf16>, vector<8x128xf32> -> vector<8x128xf32>
    %125 = arith.addf %122, %124 : vector<8x128xf32>
    %126 = math.tanh %125 : vector<8x128xf32>
    %127 = vector.extract_strided_slice %126 {offsets = [0, 0], sizes = [8, 32], strides = [1, 1]} : vector<8x128xf32> to vector<8x32xf32>
    %cst_38 = arith.constant 1.000000e+00 : f32
    %128 = vector.broadcast %cst_38 : f32 to vector<8x32xf32>
    %129 = arith.addf %128, %127 : vector<8x32xf32>
    %cst_39 = arith.constant 5.000000e-01 : f32
    %130 = vector.broadcast %cst_39 : f32 to vector<8x32xf32>
    %131 = arith.mulf %130, %129 : vector<8x32xf32>
    %132 = vector.extract_strided_slice %126 {offsets = [0, 32], sizes = [8, 32], strides = [1, 1]} : vector<8x128xf32> to vector<8x32xf32>
    %cst_40 = arith.constant 1.000000e+00 : f32
    %133 = vector.broadcast %cst_40 : f32 to vector<8x32xf32>
    %134 = arith.addf %133, %132 : vector<8x32xf32>
    %cst_41 = arith.constant 5.000000e-01 : f32
    %135 = vector.broadcast %cst_41 : f32 to vector<8x32xf32>
    %136 = arith.mulf %135, %134 : vector<8x32xf32>
    %137 = vector.extract_strided_slice %126 {offsets = [0, 64], sizes = [8, 32], strides = [1, 1]} : vector<8x128xf32> to vector<8x32xf32>
    %138 = vector.extract_strided_slice %126 {offsets = [0, 96], sizes = [8, 32], strides = [1, 1]} : vector<8x128xf32> to vector<8x32xf32>
    %cst_42 = arith.constant 1.000000e+00 : f32
    %139 = vector.broadcast %cst_42 : f32 to vector<8x32xf32>
    %140 = arith.addf %139, %138 : vector<8x32xf32>
    %cst_43 = arith.constant 5.000000e-01 : f32
    %141 = vector.broadcast %cst_43 : f32 to vector<8x32xf32>
    %142 = arith.mulf %141, %140 : vector<8x32xf32>
    %143 = arith.mulf %136, %118 : vector<8x32xf32>
    %144 = arith.mulf %131, %137 : vector<8x32xf32>
    %145 = arith.addf %143, %144 : vector<8x32xf32>
    %146 = math.tanh %145 : vector<8x32xf32>
    %147 = arith.mulf %142, %146 : vector<8x32xf32>
    %148 = vector.extract_strided_slice %9 {offsets = [5, 0, 0], sizes = [1, 8, 128], strides = [1, 1, 1]} : vector<8x8x128xf32> to vector<1x8x128xf32>
    %149 = vector.shape_cast %148 : vector<1x8x128xf32> to vector<8x128xf32>
    %150 = arith.truncf %147 : vector<8x32xf32> to vector<8x32xbf16>
    %cst_44 = arith.constant dense<0.000000e+00> : vector<8x128xf32>
    %151 = tpu.matmul %150, %10, %cst_44 {dimension_numbers = #tpu.dot_dimension_numbers<[1], [0], [0], [1], [0, 0, 1, 1], [], []>} : vector<8x32xbf16>, vector<32x128xbf16>, vector<8x128xf32> -> vector<8x128xf32>
    %152 = arith.addf %149, %151 : vector<8x128xf32>
    %153 = math.tanh %152 : vector<8x128xf32>
    %154 = vector.extract_strided_slice %153 {offsets = [0, 0], sizes = [8, 32], strides = [1, 1]} : vector<8x128xf32> to vector<8x32xf32>
    %cst_45 = arith.constant 1.000000e+00 : f32
    %155 = vector.broadcast %cst_45 : f32 to vector<8x32xf32>
    %156 = arith.addf %155, %154 : vector<8x32xf32>
    %cst_46 = arith.constant 5.000000e-01 : f32
    %157 = vector.broadcast %cst_46 : f32 to vector<8x32xf32>
    %158 = arith.mulf %157, %156 : vector<8x32xf32>
    %159 = vector.extract_strided_slice %153 {offsets = [0, 32], sizes = [8, 32], strides = [1, 1]} : vector<8x128xf32> to vector<8x32xf32>
    %cst_47 = arith.constant 1.000000e+00 : f32
    %160 = vector.broadcast %cst_47 : f32 to vector<8x32xf32>
    %161 = arith.addf %160, %159 : vector<8x32xf32>
    %cst_48 = arith.constant 5.000000e-01 : f32
    %162 = vector.broadcast %cst_48 : f32 to vector<8x32xf32>
    %163 = arith.mulf %162, %161 : vector<8x32xf32>
    %164 = vector.extract_strided_slice %153 {offsets = [0, 64], sizes = [8, 32], strides = [1, 1]} : vector<8x128xf32> to vector<8x32xf32>
    %165 = vector.extract_strided_slice %153 {offsets = [0, 96], sizes = [8, 32], strides = [1, 1]} : vector<8x128xf32> to vector<8x32xf32>
    %cst_49 = arith.constant 1.000000e+00 : f32
    %166 = vector.broadcast %cst_49 : f32 to vector<8x32xf32>
    %167 = arith.addf %166, %165 : vector<8x32xf32>
    %cst_50 = arith.constant 5.000000e-01 : f32
    %168 = vector.broadcast %cst_50 : f32 to vector<8x32xf32>
    %169 = arith.mulf %168, %167 : vector<8x32xf32>
    %170 = arith.mulf %163, %145 : vector<8x32xf32>
    %171 = arith.mulf %158, %164 : vector<8x32xf32>
    %172 = arith.addf %170, %171 : vector<8x32xf32>
    %173 = math.tanh %172 : vector<8x32xf32>
    %174 = arith.mulf %169, %173 : vector<8x32xf32>
    %175 = vector.extract_strided_slice %9 {offsets = [6, 0, 0], sizes = [1, 8, 128], strides = [1, 1, 1]} : vector<8x8x128xf32> to vector<1x8x128xf32>
    %176 = vector.shape_cast %175 : vector<1x8x128xf32> to vector<8x128xf32>
    %177 = arith.truncf %174 : vector<8x32xf32> to vector<8x32xbf16>
    %cst_51 = arith.constant dense<0.000000e+00> : vector<8x128xf32>
    %178 = tpu.matmul %177, %10, %cst_51 {dimension_numbers = #tpu.dot_dimension_numbers<[1], [0], [0], [1], [0, 0, 1, 1], [], []>} : vector<8x32xbf16>, vector<32x128xbf16>, vector<8x128xf32> -> vector<8x128xf32>
    %179 = arith.addf %176, %178 : vector<8x128xf32>
    %180 = math.tanh %179 : vector<8x128xf32>
    %181 = vector.extract_strided_slice %180 {offsets = [0, 0], sizes = [8, 32], strides = [1, 1]} : vector<8x128xf32> to vector<8x32xf32>
    %cst_52 = arith.constant 1.000000e+00 : f32
    %182 = vector.broadcast %cst_52 : f32 to vector<8x32xf32>
    %183 = arith.addf %182, %181 : vector<8x32xf32>
    %cst_53 = arith.constant 5.000000e-01 : f32
    %184 = vector.broadcast %cst_53 : f32 to vector<8x32xf32>
    %185 = arith.mulf %184, %183 : vector<8x32xf32>
    %186 = vector.extract_strided_slice %180 {offsets = [0, 32], sizes = [8, 32], strides = [1, 1]} : vector<8x128xf32> to vector<8x32xf32>
    %cst_54 = arith.constant 1.000000e+00 : f32
    %187 = vector.broadcast %cst_54 : f32 to vector<8x32xf32>
    %188 = arith.addf %187, %186 : vector<8x32xf32>
    %cst_55 = arith.constant 5.000000e-01 : f32
    %189 = vector.broadcast %cst_55 : f32 to vector<8x32xf32>
    %190 = arith.mulf %189, %188 : vector<8x32xf32>
    %191 = vector.extract_strided_slice %180 {offsets = [0, 64], sizes = [8, 32], strides = [1, 1]} : vector<8x128xf32> to vector<8x32xf32>
    %192 = vector.extract_strided_slice %180 {offsets = [0, 96], sizes = [8, 32], strides = [1, 1]} : vector<8x128xf32> to vector<8x32xf32>
    %cst_56 = arith.constant 1.000000e+00 : f32
    %193 = vector.broadcast %cst_56 : f32 to vector<8x32xf32>
    %194 = arith.addf %193, %192 : vector<8x32xf32>
    %cst_57 = arith.constant 5.000000e-01 : f32
    %195 = vector.broadcast %cst_57 : f32 to vector<8x32xf32>
    %196 = arith.mulf %195, %194 : vector<8x32xf32>
    %197 = arith.mulf %190, %172 : vector<8x32xf32>
    %198 = arith.mulf %185, %191 : vector<8x32xf32>
    %199 = arith.addf %197, %198 : vector<8x32xf32>
    %200 = math.tanh %199 : vector<8x32xf32>
    %201 = arith.mulf %196, %200 : vector<8x32xf32>
    %202 = vector.extract_strided_slice %9 {offsets = [7, 0, 0], sizes = [1, 8, 128], strides = [1, 1, 1]} : vector<8x8x128xf32> to vector<1x8x128xf32>
    %203 = vector.shape_cast %202 : vector<1x8x128xf32> to vector<8x128xf32>
    %204 = arith.truncf %201 : vector<8x32xf32> to vector<8x32xbf16>
    %cst_58 = arith.constant dense<0.000000e+00> : vector<8x128xf32>
    %205 = tpu.matmul %204, %10, %cst_58 {dimension_numbers = #tpu.dot_dimension_numbers<[1], [0], [0], [1], [0, 0, 1, 1], [], []>} : vector<8x32xbf16>, vector<32x128xbf16>, vector<8x128xf32> -> vector<8x128xf32>
    %206 = arith.addf %203, %205 : vector<8x128xf32>
    %207 = math.tanh %206 : vector<8x128xf32>
    %208 = vector.extract_strided_slice %207 {offsets = [0, 0], sizes = [8, 32], strides = [1, 1]} : vector<8x128xf32> to vector<8x32xf32>
    %cst_59 = arith.constant 1.000000e+00 : f32
    %209 = vector.broadcast %cst_59 : f32 to vector<8x32xf32>
    %210 = arith.addf %209, %208 : vector<8x32xf32>
    %cst_60 = arith.constant 5.000000e-01 : f32
    %211 = vector.broadcast %cst_60 : f32 to vector<8x32xf32>
    %212 = arith.mulf %211, %210 : vector<8x32xf32>
    %213 = vector.extract_strided_slice %207 {offsets = [0, 32], sizes = [8, 32], strides = [1, 1]} : vector<8x128xf32> to vector<8x32xf32>
    %cst_61 = arith.constant 1.000000e+00 : f32
    %214 = vector.broadcast %cst_61 : f32 to vector<8x32xf32>
    %215 = arith.addf %214, %213 : vector<8x32xf32>
    %cst_62 = arith.constant 5.000000e-01 : f32
    %216 = vector.broadcast %cst_62 : f32 to vector<8x32xf32>
    %217 = arith.mulf %216, %215 : vector<8x32xf32>
    %218 = vector.extract_strided_slice %207 {offsets = [0, 64], sizes = [8, 32], strides = [1, 1]} : vector<8x128xf32> to vector<8x32xf32>
    %219 = vector.extract_strided_slice %207 {offsets = [0, 96], sizes = [8, 32], strides = [1, 1]} : vector<8x128xf32> to vector<8x32xf32>
    %cst_63 = arith.constant 1.000000e+00 : f32
    %220 = vector.broadcast %cst_63 : f32 to vector<8x32xf32>
    %221 = arith.addf %220, %219 : vector<8x32xf32>
    %cst_64 = arith.constant 5.000000e-01 : f32
    %222 = vector.broadcast %cst_64 : f32 to vector<8x32xf32>
    %223 = arith.mulf %222, %221 : vector<8x32xf32>
    %224 = arith.mulf %217, %199 : vector<8x32xf32>
    %225 = arith.mulf %212, %218 : vector<8x32xf32>
    %226 = arith.addf %224, %225 : vector<8x32xf32>
    %227 = math.tanh %226 : vector<8x32xf32>
    %228 = arith.mulf %223, %227 : vector<8x32xf32>
    %229 = tpu.concatenate %39, %66, %93, %120, %147, %174, %201, %228 in 0 : vector<8x32xf32>, vector<8x32xf32>, vector<8x32xf32>, vector<8x32xf32>, vector<8x32xf32>, vector<8x32xf32>, vector<8x32xf32>, vector<8x32xf32> -> vector<64x32xf32>
    %230 = arith.truncf %229 : vector<64x32xf32> to vector<64x32xbf16>
    %c0_65 = arith.constant 0 : index
    %c0_66 = arith.constant 0 : index
    %231 = vector.load %arg6[%c0_65, %c0_66] : memref<32x32xbf16, #tpu.memory_space<vmem>>, vector<32x32xbf16>
    %cst_67 = arith.constant dense<0.000000e+00> : vector<64x32xf32>
    %232 = tpu.matmul %230, %231, %cst_67 {dimension_numbers = #tpu.dot_dimension_numbers<[1], [0], [0], [1], [0, 0, 1, 1], [], []>} : vector<64x32xbf16>, vector<32x32xbf16>, vector<64x32xf32> -> vector<64x32xf32>
    %c0_68 = arith.constant 0 : index
    %c0_69 = arith.constant 0 : index
    %233 = vector.load %arg7[%c0_68, %c0_69] : memref<1x32xf32, #tpu.memory_space<vmem>>, vector<1x32xf32>
    %234 = vector.broadcast %233 : vector<1x32xf32> to vector<64x32xf32>
    %235 = arith.addf %232, %234 : vector<64x32xf32>
    %236 = vector.shape_cast %235 : vector<64x32xf32> to vector<8x8x32xf32>
    %c0_70 = arith.constant 0 : index
    %c0_71 = arith.constant 0 : index
    %c0_72 = arith.constant 0 : index
    %237 = vector.load %arg14[%c0_70, %c0_71, %c0_72] : memref<8x8x32xf32, #tpu.memory_space<vmem>>, vector<8x8x32xf32>
    tpu.vector_store %arg14[%c0_70, %c0_71, %c0_72], %236 {strides = array<i32>} : memref<8x8x32xf32, #tpu.memory_space<vmem>>, vector<8x8x32xf32>,
    %238 = vector.extract_strided_slice %235 {offsets = [0, 0], sizes = [64, 16], strides = [1, 1]} : vector<64x32xf32> to vector<64x16xf32>
    %239 = vector.extract_strided_slice %235 {offsets = [0, 16], sizes = [64, 16], strides = [1, 1]} : vector<64x32xf32> to vector<64x16xf32>
    %c0_73 = arith.constant 0 : index
    %c0_74 = arith.constant 0 : index
    %c0_75 = arith.constant 0 : index
    %240 = vector.load %arg2[%c0_73, %c0_74, %c0_75] : memref<8x8x16xf32, #tpu.memory_space<vmem>>, vector<8x8x16xf32>
    %241 = vector.shape_cast %240 : vector<8x8x16xf32> to vector<64x16xf32>
    %cst_76 = arith.constant 5.000000e-01 : f32
    %242 = vector.broadcast %cst_76 : f32 to vector<64x16xf32>
    %243 = arith.mulf %242, %239 : vector<64x16xf32>
    %244 = math.exp %243 : vector<64x16xf32>
    %245 = arith.mulf %241, %244 : vector<64x16xf32>
    %246 = arith.addf %238, %245 : vector<64x16xf32>
    %247 = arith.truncf %246 : vector<64x16xf32> to vector<64x16xbf16>
    %c0_77 = arith.constant 0 : index
    %c0_78 = arith.constant 0 : index
    %248 = vector.load %arg8[%c0_77, %c0_78] : memref<16x128xbf16, #tpu.memory_space<vmem>>, vector<16x128xbf16>
    %cst_79 = arith.constant dense<0.000000e+00> : vector<64x128xf32>
    %249 = tpu.matmul %247, %248, %cst_79 {dimension_numbers = #tpu.dot_dimension_numbers<[1], [0], [0], [1], [0, 0, 1, 1], [], []>} : vector<64x16xbf16>, vector<16x128xbf16>, vector<64x128xf32> -> vector<64x128xf32>
    %c0_80 = arith.constant 0 : index
    %c0_81 = arith.constant 0 : index
    %250 = vector.load %arg10[%c0_80, %c0_81] : memref<1x128xf32, #tpu.memory_space<vmem>>, vector<1x128xf32>
    %251 = vector.broadcast %250 : vector<1x128xf32> to vector<64x128xf32>
    %252 = arith.addf %249, %251 : vector<64x128xf32>
    %c0_82 = arith.constant 0 : index
    %c0_83 = arith.constant 0 : index
    %253 = vector.load %arg9[%c0_82, %c0_83] : memref<32x128xbf16, #tpu.memory_space<vmem>>, vector<32x128xbf16>
    %cst_84 = arith.constant 0.000000e+00 : f32
    %254 = vector.broadcast %cst_84 : f32 to vector<8x32xf32>
    %cst_85 = arith.constant 0.000000e+00 : f32
    %255 = vector.broadcast %cst_85 : f32 to vector<8x32xf32>
    %256 = vector.extract_strided_slice %252 {offsets = [0, 0], sizes = [8, 128], strides = [1, 1]} : vector<64x128xf32> to vector<8x128xf32>
    %257 = arith.truncf %254 : vector<8x32xf32> to vector<8x32xbf16>
    %cst_86 = arith.constant dense<0.000000e+00> : vector<8x128xf32>
    %258 = tpu.matmul %257, %253, %cst_86 {dimension_numbers = #tpu.dot_dimension_numbers<[1], [0], [0], [1], [0, 0, 1, 1], [], []>} : vector<8x32xbf16>, vector<32x128xbf16>, vector<8x128xf32> -> vector<8x128xf32>
    %259 = arith.addf %256, %258 : vector<8x128xf32>
    %260 = math.tanh %259 : vector<8x128xf32>
    %261 = vector.extract_strided_slice %260 {offsets = [0, 0], sizes = [8, 32], strides = [1, 1]} : vector<8x128xf32> to vector<8x32xf32>
    %cst_87 = arith.constant 1.000000e+00 : f32
    %262 = vector.broadcast %cst_87 : f32 to vector<8x32xf32>
    %263 = arith.addf %262, %261 : vector<8x32xf32>
    %cst_88 = arith.constant 5.000000e-01 : f32
    %264 = vector.broadcast %cst_88 : f32 to vector<8x32xf32>
    %265 = arith.mulf %264, %263 : vector<8x32xf32>
    %266 = vector.extract_strided_slice %260 {offsets = [0, 32], sizes = [8, 32], strides = [1, 1]} : vector<8x128xf32> to vector<8x32xf32>
    %cst_89 = arith.constant 1.000000e+00 : f32
    %267 = vector.broadcast %cst_89 : f32 to vector<8x32xf32>
    %268 = arith.addf %267, %266 : vector<8x32xf32>
    %cst_90 = arith.constant 5.000000e-01 : f32
    %269 = vector.broadcast %cst_90 : f32 to vector<8x32xf32>
    %270 = arith.mulf %269, %268 : vector<8x32xf32>
    %271 = vector.extract_strided_slice %260 {offsets = [0, 64], sizes = [8, 32], strides = [1, 1]} : vector<8x128xf32> to vector<8x32xf32>
    %272 = vector.extract_strided_slice %260 {offsets = [0, 96], sizes = [8, 32], strides = [1, 1]} : vector<8x128xf32> to vector<8x32xf32>
    %cst_91 = arith.constant 1.000000e+00 : f32
    %273 = vector.broadcast %cst_91 : f32 to vector<8x32xf32>
    %274 = arith.addf %273, %272 : vector<8x32xf32>
    %cst_92 = arith.constant 5.000000e-01 : f32
    %275 = vector.broadcast %cst_92 : f32 to vector<8x32xf32>
    %276 = arith.mulf %275, %274 : vector<8x32xf32>
    %277 = arith.mulf %270, %255 : vector<8x32xf32>
    %278 = arith.mulf %265, %271 : vector<8x32xf32>
    %279 = arith.addf %277, %278 : vector<8x32xf32>
    %280 = math.tanh %279 : vector<8x32xf32>
    %281 = arith.mulf %276, %280 : vector<8x32xf32>
    %282 = vector.extract_strided_slice %252 {offsets = [8, 0], sizes = [8, 128], strides = [1, 1]} : vector<64x128xf32> to vector<8x128xf32>
    %283 = arith.truncf %281 : vector<8x32xf32> to vector<8x32xbf16>
    %cst_93 = arith.constant dense<0.000000e+00> : vector<8x128xf32>
    %284 = tpu.matmul %283, %253, %cst_93 {dimension_numbers = #tpu.dot_dimension_numbers<[1], [0], [0], [1], [0, 0, 1, 1], [], []>} : vector<8x32xbf16>, vector<32x128xbf16>, vector<8x128xf32> -> vector<8x128xf32>
    %285 = arith.addf %282, %284 : vector<8x128xf32>
    %286 = math.tanh %285 : vector<8x128xf32>
    %287 = vector.extract_strided_slice %286 {offsets = [0, 0], sizes = [8, 32], strides = [1, 1]} : vector<8x128xf32> to vector<8x32xf32>
    %cst_94 = arith.constant 1.000000e+00 : f32
    %288 = vector.broadcast %cst_94 : f32 to vector<8x32xf32>
    %289 = arith.addf %288, %287 : vector<8x32xf32>
    %cst_95 = arith.constant 5.000000e-01 : f32
    %290 = vector.broadcast %cst_95 : f32 to vector<8x32xf32>
    %291 = arith.mulf %290, %289 : vector<8x32xf32>
    %292 = vector.extract_strided_slice %286 {offsets = [0, 32], sizes = [8, 32], strides = [1, 1]} : vector<8x128xf32> to vector<8x32xf32>
    %cst_96 = arith.constant 1.000000e+00 : f32
    %293 = vector.broadcast %cst_96 : f32 to vector<8x32xf32>
    %294 = arith.addf %293, %292 : vector<8x32xf32>
    %cst_97 = arith.constant 5.000000e-01 : f32
    %295 = vector.broadcast %cst_97 : f32 to vector<8x32xf32>
    %296 = arith.mulf %295, %294 : vector<8x32xf32>
    %297 = vector.extract_strided_slice %286 {offsets = [0, 64], sizes = [8, 32], strides = [1, 1]} : vector<8x128xf32> to vector<8x32xf32>
    %298 = vector.extract_strided_slice %286 {offsets = [0, 96], sizes = [8, 32], strides = [1, 1]} : vector<8x128xf32> to vector<8x32xf32>
    %cst_98 = arith.constant 1.000000e+00 : f32
    %299 = vector.broadcast %cst_98 : f32 to vector<8x32xf32>
    %300 = arith.addf %299, %298 : vector<8x32xf32>
    %cst_99 = arith.constant 5.000000e-01 : f32
    %301 = vector.broadcast %cst_99 : f32 to vector<8x32xf32>
    %302 = arith.mulf %301, %300 : vector<8x32xf32>
    %303 = arith.mulf %296, %279 : vector<8x32xf32>
    %304 = arith.mulf %291, %297 : vector<8x32xf32>
    %305 = arith.addf %303, %304 : vector<8x32xf32>
    %306 = math.tanh %305 : vector<8x32xf32>
    %307 = arith.mulf %302, %306 : vector<8x32xf32>
    %308 = vector.extract_strided_slice %252 {offsets = [16, 0], sizes = [8, 128], strides = [1, 1]} : vector<64x128xf32> to vector<8x128xf32>
    %309 = arith.truncf %307 : vector<8x32xf32> to vector<8x32xbf16>
    %cst_100 = arith.constant dense<0.000000e+00> : vector<8x128xf32>
    %310 = tpu.matmul %309, %253, %cst_100 {dimension_numbers = #tpu.dot_dimension_numbers<[1], [0], [0], [1], [0, 0, 1, 1], [], []>} : vector<8x32xbf16>, vector<32x128xbf16>, vector<8x128xf32> -> vector<8x128xf32>
    %311 = arith.addf %308, %310 : vector<8x128xf32>
    %312 = math.tanh %311 : vector<8x128xf32>
    %313 = vector.extract_strided_slice %312 {offsets = [0, 0], sizes = [8, 32], strides = [1, 1]} : vector<8x128xf32> to vector<8x32xf32>
    %cst_101 = arith.constant 1.000000e+00 : f32
    %314 = vector.broadcast %cst_101 : f32 to vector<8x32xf32>
    %315 = arith.addf %314, %313 : vector<8x32xf32>
    %cst_102 = arith.constant 5.000000e-01 : f32
    %316 = vector.broadcast %cst_102 : f32 to vector<8x32xf32>
    %317 = arith.mulf %316, %315 : vector<8x32xf32>
    %318 = vector.extract_strided_slice %312 {offsets = [0, 32], sizes = [8, 32], strides = [1, 1]} : vector<8x128xf32> to vector<8x32xf32>
    %cst_103 = arith.constant 1.000000e+00 : f32
    %319 = vector.broadcast %cst_103 : f32 to vector<8x32xf32>
    %320 = arith.addf %319, %318 : vector<8x32xf32>
    %cst_104 = arith.constant 5.000000e-01 : f32
    %321 = vector.broadcast %cst_104 : f32 to vector<8x32xf32>
    %322 = arith.mulf %321, %320 : vector<8x32xf32>
    %323 = vector.extract_strided_slice %312 {offsets = [0, 64], sizes = [8, 32], strides = [1, 1]} : vector<8x128xf32> to vector<8x32xf32>
    %324 = vector.extract_strided_slice %312 {offsets = [0, 96], sizes = [8, 32], strides = [1, 1]} : vector<8x128xf32> to vector<8x32xf32>
    %cst_105 = arith.constant 1.000000e+00 : f32
    %325 = vector.broadcast %cst_105 : f32 to vector<8x32xf32>
    %326 = arith.addf %325, %324 : vector<8x32xf32>
    %cst_106 = arith.constant 5.000000e-01 : f32
    %327 = vector.broadcast %cst_106 : f32 to vector<8x32xf32>
    %328 = arith.mulf %327, %326 : vector<8x32xf32>
    %329 = arith.mulf %322, %305 : vector<8x32xf32>
    %330 = arith.mulf %317, %323 : vector<8x32xf32>
    %331 = arith.addf %329, %330 : vector<8x32xf32>
    %332 = math.tanh %331 : vector<8x32xf32>
    %333 = arith.mulf %328, %332 : vector<8x32xf32>
    %334 = vector.extract_strided_slice %252 {offsets = [24, 0], sizes = [8, 128], strides = [1, 1]} : vector<64x128xf32> to vector<8x128xf32>
    %335 = arith.truncf %333 : vector<8x32xf32> to vector<8x32xbf16>
    %cst_107 = arith.constant dense<0.000000e+00> : vector<8x128xf32>
    %336 = tpu.matmul %335, %253, %cst_107 {dimension_numbers = #tpu.dot_dimension_numbers<[1], [0], [0], [1], [0, 0, 1, 1], [], []>} : vector<8x32xbf16>, vector<32x128xbf16>, vector<8x128xf32> -> vector<8x128xf32>
    %337 = arith.addf %334, %336 : vector<8x128xf32>
    %338 = math.tanh %337 : vector<8x128xf32>
    %339 = vector.extract_strided_slice %338 {offsets = [0, 0], sizes = [8, 32], strides = [1, 1]} : vector<8x128xf32> to vector<8x32xf32>
    %cst_108 = arith.constant 1.000000e+00 : f32
    %340 = vector.broadcast %cst_108 : f32 to vector<8x32xf32>
    %341 = arith.addf %340, %339 : vector<8x32xf32>
    %cst_109 = arith.constant 5.000000e-01 : f32
    %342 = vector.broadcast %cst_109 : f32 to vector<8x32xf32>
    %343 = arith.mulf %342, %341 : vector<8x32xf32>
    %344 = vector.extract_strided_slice %338 {offsets = [0, 32], sizes = [8, 32], strides = [1, 1]} : vector<8x128xf32> to vector<8x32xf32>
    %cst_110 = arith.constant 1.000000e+00 : f32
    %345 = vector.broadcast %cst_110 : f32 to vector<8x32xf32>
    %346 = arith.addf %345, %344 : vector<8x32xf32>
    %cst_111 = arith.constant 5.000000e-01 : f32
    %347 = vector.broadcast %cst_111 : f32 to vector<8x32xf32>
    %348 = arith.mulf %347, %346 : vector<8x32xf32>
    %349 = vector.extract_strided_slice %338 {offsets = [0, 64], sizes = [8, 32], strides = [1, 1]} : vector<8x128xf32> to vector<8x32xf32>
    %350 = vector.extract_strided_slice %338 {offsets = [0, 96], sizes = [8, 32], strides = [1, 1]} : vector<8x128xf32> to vector<8x32xf32>
    %cst_112 = arith.constant 1.000000e+00 : f32
    %351 = vector.broadcast %cst_112 : f32 to vector<8x32xf32>
    %352 = arith.addf %351, %350 : vector<8x32xf32>
    %cst_113 = arith.constant 5.000000e-01 : f32
    %353 = vector.broadcast %cst_113 : f32 to vector<8x32xf32>
    %354 = arith.mulf %353, %352 : vector<8x32xf32>
    %355 = arith.mulf %348, %331 : vector<8x32xf32>
    %356 = arith.mulf %343, %349 : vector<8x32xf32>
    %357 = arith.addf %355, %356 : vector<8x32xf32>
    %358 = math.tanh %357 : vector<8x32xf32>
    %359 = arith.mulf %354, %358 : vector<8x32xf32>
    %360 = vector.extract_strided_slice %252 {offsets = [32, 0], sizes = [8, 128], strides = [1, 1]} : vector<64x128xf32> to vector<8x128xf32>
    %361 = arith.truncf %359 : vector<8x32xf32> to vector<8x32xbf16>
    %cst_114 = arith.constant dense<0.000000e+00> : vector<8x128xf32>
    %362 = tpu.matmul %361, %253, %cst_114 {dimension_numbers = #tpu.dot_dimension_numbers<[1], [0], [0], [1], [0, 0, 1, 1], [], []>} : vector<8x32xbf16>, vector<32x128xbf16>, vector<8x128xf32> -> vector<8x128xf32>
    %363 = arith.addf %360, %362 : vector<8x128xf32>
    %364 = math.tanh %363 : vector<8x128xf32>
    %365 = vector.extract_strided_slice %364 {offsets = [0, 0], sizes = [8, 32], strides = [1, 1]} : vector<8x128xf32> to vector<8x32xf32>
    %cst_115 = arith.constant 1.000000e+00 : f32
    %366 = vector.broadcast %cst_115 : f32 to vector<8x32xf32>
    %367 = arith.addf %366, %365 : vector<8x32xf32>
    %cst_116 = arith.constant 5.000000e-01 : f32
    %368 = vector.broadcast %cst_116 : f32 to vector<8x32xf32>
    %369 = arith.mulf %368, %367 : vector<8x32xf32>
    %370 = vector.extract_strided_slice %364 {offsets = [0, 32], sizes = [8, 32], strides = [1, 1]} : vector<8x128xf32> to vector<8x32xf32>
    %cst_117 = arith.constant 1.000000e+00 : f32
    %371 = vector.broadcast %cst_117 : f32 to vector<8x32xf32>
    %372 = arith.addf %371, %370 : vector<8x32xf32>
    %cst_118 = arith.constant 5.000000e-01 : f32
    %373 = vector.broadcast %cst_118 : f32 to vector<8x32xf32>
    %374 = arith.mulf %373, %372 : vector<8x32xf32>
    %375 = vector.extract_strided_slice %364 {offsets = [0, 64], sizes = [8, 32], strides = [1, 1]} : vector<8x128xf32> to vector<8x32xf32>
    %376 = vector.extract_strided_slice %364 {offsets = [0, 96], sizes = [8, 32], strides = [1, 1]} : vector<8x128xf32> to vector<8x32xf32>
    %cst_119 = arith.constant 1.000000e+00 : f32
    %377 = vector.broadcast %cst_119 : f32 to vector<8x32xf32>
    %378 = arith.addf %377, %376 : vector<8x32xf32>
    %cst_120 = arith.constant 5.000000e-01 : f32
    %379 = vector.broadcast %cst_120 : f32 to vector<8x32xf32>
    %380 = arith.mulf %379, %378 : vector<8x32xf32>
    %381 = arith.mulf %374, %357 : vector<8x32xf32>
    %382 = arith.mulf %369, %375 : vector<8x32xf32>
    %383 = arith.addf %381, %382 : vector<8x32xf32>
    %384 = math.tanh %383 : vector<8x32xf32>
    %385 = arith.mulf %380, %384 : vector<8x32xf32>
    %386 = vector.extract_strided_slice %252 {offsets = [40, 0], sizes = [8, 128], strides = [1, 1]} : vector<64x128xf32> to vector<8x128xf32>
    %387 = arith.truncf %385 : vector<8x32xf32> to vector<8x32xbf16>
    %cst_121 = arith.constant dense<0.000000e+00> : vector<8x128xf32>
    %388 = tpu.matmul %387, %253, %cst_121 {dimension_numbers = #tpu.dot_dimension_numbers<[1], [0], [0], [1], [0, 0, 1, 1], [], []>} : vector<8x32xbf16>, vector<32x128xbf16>, vector<8x128xf32> -> vector<8x128xf32>
    %389 = arith.addf %386, %388 : vector<8x128xf32>
    %390 = math.tanh %389 : vector<8x128xf32>
    %391 = vector.extract_strided_slice %390 {offsets = [0, 0], sizes = [8, 32], strides = [1, 1]} : vector<8x128xf32> to vector<8x32xf32>
    %cst_122 = arith.constant 1.000000e+00 : f32
    %392 = vector.broadcast %cst_122 : f32 to vector<8x32xf32>
    %393 = arith.addf %392, %391 : vector<8x32xf32>
    %cst_123 = arith.constant 5.000000e-01 : f32
    %394 = vector.broadcast %cst_123 : f32 to vector<8x32xf32>
    %395 = arith.mulf %394, %393 : vector<8x32xf32>
    %396 = vector.extract_strided_slice %390 {offsets = [0, 32], sizes = [8, 32], strides = [1, 1]} : vector<8x128xf32> to vector<8x32xf32>
    %cst_124 = arith.constant 1.000000e+00 : f32
    %397 = vector.broadcast %cst_124 : f32 to vector<8x32xf32>
    %398 = arith.addf %397, %396 : vector<8x32xf32>
    %cst_125 = arith.constant 5.000000e-01 : f32
    %399 = vector.broadcast %cst_125 : f32 to vector<8x32xf32>
    %400 = arith.mulf %399, %398 : vector<8x32xf32>
    %401 = vector.extract_strided_slice %390 {offsets = [0, 64], sizes = [8, 32], strides = [1, 1]} : vector<8x128xf32> to vector<8x32xf32>
    %402 = vector.extract_strided_slice %390 {offsets = [0, 96], sizes = [8, 32], strides = [1, 1]} : vector<8x128xf32> to vector<8x32xf32>
    %cst_126 = arith.constant 1.000000e+00 : f32
    %403 = vector.broadcast %cst_126 : f32 to vector<8x32xf32>
    %404 = arith.addf %403, %402 : vector<8x32xf32>
    %cst_127 = arith.constant 5.000000e-01 : f32
    %405 = vector.broadcast %cst_127 : f32 to vector<8x32xf32>
    %406 = arith.mulf %405, %404 : vector<8x32xf32>
    %407 = arith.mulf %400, %383 : vector<8x32xf32>
    %408 = arith.mulf %395, %401 : vector<8x32xf32>
    %409 = arith.addf %407, %408 : vector<8x32xf32>
    %410 = math.tanh %409 : vector<8x32xf32>
    %411 = arith.mulf %406, %410 : vector<8x32xf32>
    %412 = vector.extract_strided_slice %252 {offsets = [48, 0], sizes = [8, 128], strides = [1, 1]} : vector<64x128xf32> to vector<8x128xf32>
    %413 = arith.truncf %411 : vector<8x32xf32> to vector<8x32xbf16>
    %cst_128 = arith.constant dense<0.000000e+00> : vector<8x128xf32>
    %414 = tpu.matmul %413, %253, %cst_128 {dimension_numbers = #tpu.dot_dimension_numbers<[1], [0], [0], [1], [0, 0, 1, 1], [], []>} : vector<8x32xbf16>, vector<32x128xbf16>, vector<8x128xf32> -> vector<8x128xf32>
    %415 = arith.addf %412, %414 : vector<8x128xf32>
    %416 = math.tanh %415 : vector<8x128xf32>
    %417 = vector.extract_strided_slice %416 {offsets = [0, 0], sizes = [8, 32], strides = [1, 1]} : vector<8x128xf32> to vector<8x32xf32>
    %cst_129 = arith.constant 1.000000e+00 : f32
    %418 = vector.broadcast %cst_129 : f32 to vector<8x32xf32>
    %419 = arith.addf %418, %417 : vector<8x32xf32>
    %cst_130 = arith.constant 5.000000e-01 : f32
    %420 = vector.broadcast %cst_130 : f32 to vector<8x32xf32>
    %421 = arith.mulf %420, %419 : vector<8x32xf32>
    %422 = vector.extract_strided_slice %416 {offsets = [0, 32], sizes = [8, 32], strides = [1, 1]} : vector<8x128xf32> to vector<8x32xf32>
    %cst_131 = arith.constant 1.000000e+00 : f32
    %423 = vector.broadcast %cst_131 : f32 to vector<8x32xf32>
    %424 = arith.addf %423, %422 : vector<8x32xf32>
    %cst_132 = arith.constant 5.000000e-01 : f32
    %425 = vector.broadcast %cst_132 : f32 to vector<8x32xf32>
    %426 = arith.mulf %425, %424 : vector<8x32xf32>
    %427 = vector.extract_strided_slice %416 {offsets = [0, 64], sizes = [8, 32], strides = [1, 1]} : vector<8x128xf32> to vector<8x32xf32>
    %428 = vector.extract_strided_slice %416 {offsets = [0, 96], sizes = [8, 32], strides = [1, 1]} : vector<8x128xf32> to vector<8x32xf32>
    %cst_133 = arith.constant 1.000000e+00 : f32
    %429 = vector.broadcast %cst_133 : f32 to vector<8x32xf32>
    %430 = arith.addf %429, %428 : vector<8x32xf32>
    %cst_134 = arith.constant 5.000000e-01 : f32
    %431 = vector.broadcast %cst_134 : f32 to vector<8x32xf32>
    %432 = arith.mulf %431, %430 : vector<8x32xf32>
    %433 = arith.mulf %426, %409 : vector<8x32xf32>
    %434 = arith.mulf %421, %427 : vector<8x32xf32>
    %435 = arith.addf %433, %434 : vector<8x32xf32>
    %436 = math.tanh %435 : vector<8x32xf32>
    %437 = arith.mulf %432, %436 : vector<8x32xf32>
    %438 = vector.extract_strided_slice %252 {offsets = [56, 0], sizes = [8, 128], strides = [1, 1]} : vector<64x128xf32> to vector<8x128xf32>
    %439 = arith.truncf %437 : vector<8x32xf32> to vector<8x32xbf16>
    %cst_135 = arith.constant dense<0.000000e+00> : vector<8x128xf32>
    %440 = tpu.matmul %439, %253, %cst_135 {dimension_numbers = #tpu.dot_dimension_numbers<[1], [0], [0], [1], [0, 0, 1, 1], [], []>} : vector<8x32xbf16>, vector<32x128xbf16>, vector<8x128xf32> -> vector<8x128xf32>
    %441 = arith.addf %438, %440 : vector<8x128xf32>
    %442 = math.tanh %441 : vector<8x128xf32>
    %443 = vector.extract_strided_slice %442 {offsets = [0, 0], sizes = [8, 32], strides = [1, 1]} : vector<8x128xf32> to vector<8x32xf32>
    %cst_136 = arith.constant 1.000000e+00 : f32
    %444 = vector.broadcast %cst_136 : f32 to vector<8x32xf32>
    %445 = arith.addf %444, %443 : vector<8x32xf32>
    %cst_137 = arith.constant 5.000000e-01 : f32
    %446 = vector.broadcast %cst_137 : f32 to vector<8x32xf32>
    %447 = arith.mulf %446, %445 : vector<8x32xf32>
    %448 = vector.extract_strided_slice %442 {offsets = [0, 32], sizes = [8, 32], strides = [1, 1]} : vector<8x128xf32> to vector<8x32xf32>
    %cst_138 = arith.constant 1.000000e+00 : f32
    %449 = vector.broadcast %cst_138 : f32 to vector<8x32xf32>
    %450 = arith.addf %449, %448 : vector<8x32xf32>
    %cst_139 = arith.constant 5.000000e-01 : f32
    %451 = vector.broadcast %cst_139 : f32 to vector<8x32xf32>
    %452 = arith.mulf %451, %450 : vector<8x32xf32>
    %453 = vector.extract_strided_slice %442 {offsets = [0, 64], sizes = [8, 32], strides = [1, 1]} : vector<8x128xf32> to vector<8x32xf32>
    %454 = vector.extract_strided_slice %442 {offsets = [0, 96], sizes = [8, 32], strides = [1, 1]} : vector<8x128xf32> to vector<8x32xf32>
    %cst_140 = arith.constant 1.000000e+00 : f32
    %455 = vector.broadcast %cst_140 : f32 to vector<8x32xf32>
    %456 = arith.addf %455, %454 : vector<8x32xf32>
    %cst_141 = arith.constant 5.000000e-01 : f32
    %457 = vector.broadcast %cst_141 : f32 to vector<8x32xf32>
    %458 = arith.mulf %457, %456 : vector<8x32xf32>
    %459 = arith.mulf %452, %435 : vector<8x32xf32>
    %460 = arith.mulf %447, %453 : vector<8x32xf32>
    %461 = arith.addf %459, %460 : vector<8x32xf32>
    %462 = math.tanh %461 : vector<8x32xf32>
    %463 = arith.mulf %458, %462 : vector<8x32xf32>
    %464 = tpu.concatenate %281, %307, %333, %359, %385, %411, %437, %463 in 0 : vector<8x32xf32>, vector<8x32xf32>, vector<8x32xf32>, vector<8x32xf32>, vector<8x32xf32>, vector<8x32xf32>, vector<8x32xf32>, vector<8x32xf32> -> vector<64x32xf32>
    %c0_142 = arith.constant 0 : index
    %c0_143 = arith.constant 0 : index
    %465 = vector.load %arg11[%c0_142, %c0_143] : memref<1x32xf32, #tpu.memory_space<vmem>>, vector<1x32xf32>
    %466 = vector.broadcast %465 : vector<1x32xf32> to vector<64x32xf32>
    %467 = arith.mulf %464, %466 : vector<64x32xf32>
    %cst_144 = arith.constant dense<0.000000e+00> : vector<64xf32>
    %468 = vector.multi_reduction <add>, %467, %cst_144 [1] : vector<64x32xf32> to vector<64xf32>
    %469 = vector.shape_cast %468 : vector<64xf32> to vector<64x1xf32>
    %c0_145 = arith.constant 0 : index
    %c0_146 = arith.constant 0 : index
    %470 = vector.load %arg12[%c0_145, %c0_146] : memref<1x1xf32, #tpu.memory_space<vmem>>, vector<1x1xf32>
    %471 = vector.broadcast %470 : vector<1x1xf32> to vector<64x1xf32>
    %472 = arith.addf %469, %471 : vector<64x1xf32>
    %473 = vector.shape_cast %472 : vector<64x1xf32> to vector<8x8x1xf32>
    %c0_147 = arith.constant 0 : index
    %c0_148 = arith.constant 0 : index
    %c0_149 = arith.constant 0 : index
    %474 = vector.load %arg13[%c0_147, %c0_148, %c0_149] : memref<8x8x1xf32, #tpu.memory_space<vmem>>, vector<8x8x1xf32>
    tpu.vector_store %arg13[%c0_147, %c0_148, %c0_149], %473 {strides = array<i32>} : memref<8x8x1xf32, #tpu.memory_space<vmem>>, vector<8x8x1xf32>,
    return
  }
  func.func @transform_0(%arg0: i32) -> (i32, i32, i32) {
    %c0_i32 = arith.constant 0 : i32
    %c0_i32_0 = arith.constant 0 : i32
    %c0_i32_1 = arith.constant 0 : i32
    return %c0_i32, %arg0, %c0_i32_0 : i32, i32, i32
  }
  func.func @transform_1(%arg0: i32) -> (i32, i32, i32) {
    %c0_i32 = arith.constant 0 : i32
    %c0_i32_0 = arith.constant 0 : i32
    %c0_i32_1 = arith.constant 0 : i32
    return %c0_i32, %arg0, %c0_i32_0 : i32, i32, i32
  }
  func.func @transform_2(%arg0: i32) -> (i32, i32) {
    %c0_i32 = arith.constant 0 : i32
    %c0_i32_0 = arith.constant 0 : i32
    %c0_i32_1 = arith.constant 0 : i32
    return %c0_i32, %c0_i32_0 : i32, i32
  }
  func.func @transform_3(%arg0: i32) -> (i32, i32) {
    %c0_i32 = arith.constant 0 : i32
    %c0_i32_0 = arith.constant 0 : i32
    %c0_i32_1 = arith.constant 0 : i32
    return %c0_i32, %c0_i32_0 : i32, i32
  }
  func.func @transform_4(%arg0: i32) -> (i32, i32) {
    %c0_i32 = arith.constant 0 : i32
    %c0_i32_0 = arith.constant 0 : i32
    %c0_i32_1 = arith.constant 0 : i32
    return %c0_i32, %c0_i32_0 : i32, i32
  }
  func.func @transform_5(%arg0: i32) -> (i32, i32) {
    %c0_i32 = arith.constant 0 : i32
    %c0_i32_0 = arith.constant 0 : i32
    %c0_i32_1 = arith.constant 0 : i32
    return %c0_i32, %c0_i32_0 : i32, i32
  }
  func.func @transform_6(%arg0: i32) -> (i32, i32) {
    %c0_i32 = arith.constant 0 : i32
    %c0_i32_0 = arith.constant 0 : i32
    %c0_i32_1 = arith.constant 0 : i32
    return %c0_i32, %c0_i32_0 : i32, i32
  }
  func.func @transform_7(%arg0: i32) -> (i32, i32) {
    %c0_i32 = arith.constant 0 : i32
    %c0_i32_0 = arith.constant 0 : i32
    %c0_i32_1 = arith.constant 0 : i32
    return %c0_i32, %c0_i32_0 : i32, i32
  }
  func.func @transform_8(%arg0: i32) -> (i32, i32) {
    %c0_i32 = arith.constant 0 : i32
    %c0_i32_0 = arith.constant 0 : i32
    %c0_i32_1 = arith.constant 0 : i32
    return %c0_i32, %c0_i32_0 : i32, i32
  }
  func.func @transform_9(%arg0: i32) -> (i32, i32) {
    %c0_i32 = arith.constant 0 : i32
    %c0_i32_0 = arith.constant 0 : i32
    %c0_i32_1 = arith.constant 0 : i32
    return %c0_i32, %c0_i32_0 : i32, i32
  }
  func.func @transform_10(%arg0: i32) -> (i32, i32) {
    %c0_i32 = arith.constant 0 : i32
    %c0_i32_0 = arith.constant 0 : i32
    %c0_i32_1 = arith.constant 0 : i32
    return %c0_i32, %c0_i32_0 : i32, i32
  }
  func.func @transform_11(%arg0: i32) -> (i32, i32) {
    %c0_i32 = arith.constant 0 : i32
    %c0_i32_0 = arith.constant 0 : i32
    %c0_i32_1 = arith.constant 0 : i32
    return %c0_i32, %c0_i32_0 : i32, i32
  }
  func.func @transform_12(%arg0: i32) -> (i32, i32, i32) {
    %c0_i32 = arith.constant 0 : i32
    %c0_i32_0 = arith.constant 0 : i32
    %c0_i32_1 = arith.constant 0 : i32
    return %c0_i32, %arg0, %c0_i32_0 : i32, i32, i32
  }
  func.func @transform_13(%arg0: i32) -> (i32, i32, i32) {
    %c0_i32 = arith.constant 0 : i32
    %c0_i32_0 = arith.constant 0 : i32
    %c0_i32_1 = arith.constant 0 : i32
    return %c0_i32, %arg0, %c0_i32_0 : i32, i32, i32
  }
}

</mosaic_0001>

<bundles_post_ra>
// kernel: omni_anomaly_forward.1
= control target key start
LH: loop header
LB: loop body
LE: loop exit
PB: predicated region body
PF: predicated region fallthrough
CT: control target
= control target key end

     0   :  { %v1980_v0 = vmov 0.0   ;;  %vm1981_vm0 = vmmov 0   ;;  %v1982_v2 = vmov 0   ;;  %s1983_s17 = smov 64   ;;  %vm140_vm1 = vcmask 261120   ;;  %s1985_s24 = smov 112   ;;  %s2592_s3 = inlined_call_operand.vmem [shape: bf16[32,128], index: 3, kind: input, shape index: {}]   ;;  %s2593_s0 = inlined_call_operand.vmem [shape: f32[8,8,1], index: 0, kind: input, shape index: {}]   ;;  %s2594_s2 = inlined_call_operand.vmem [shape: f32[1,128], index: 2, kind: input, shape index: {}]   ;;  %s2595_s4 = inlined_call_operand.vmem [shape: f32[1,128], index: 4, kind: input, shape index: {}]   ;;  %s2596_s5 = inlined_call_operand.vmem [shape: bf16[32,32], index: 5, kind: input, shape index: {}]   ;;  %s2597_s6 = inlined_call_operand.vmem [shape: f32[1,32], index: 6, kind: input, shape index: {}]   ;;  %s2598_s13 = inlined_call_operand.vmem [shape: f32[8,8,32], index: 13, kind: output, shape index: {1}]   ;;  %s2599_s7 = inlined_call_operand.vmem [shape: bf16[16,128], index: 7, kind: input, shape index: {}]   ;;  %s2600_s8 = inlined_call_operand.vmem [shape: bf16[32,128], index: 8, kind: input, shape index: {}]   ;;  %s2601_s1 = inlined_call_operand.vmem [shape: f32[8,8,16], index: 1, kind: input, shape index: {}]   ;;  %s2602_s9 = inlined_call_operand.vmem [shape: f32[1,128], index: 9, kind: input, shape index: {}]   ;;  %s2603_s10 = inlined_call_operand.vmem [shape: f32[1,32], index: 10, kind: input, shape index: {}]   ;;  %s2604_s11 = inlined_call_operand.<no memory space> [shape: f32[1,1], index: 11, kind: input, shape index: {}]   ;;  %s2605_s12 = inlined_call_operand.vmem [shape: f32[8,8,1], index: 12, kind: output, shape index: {0}]  }
   0x1   :  { %1734 = vmatprep.subr.bf16.mxu0 %v1980_v0  ;;  %v2061_v1 = vld [vmem:[%s2592_s3] sm:$0xff]   ;;  %1738 = vmatprep.mubr.msk.bf16.mxu0 %vm1981_vm0, %v1980_v0  ;;  %v2071_v3 = vld [vmem:[%s2592_s3 + $0x8] sm:$0xff]   ;;  %v48_v46 = vld [vmem:[%s2593_s0 + $0x10] sm:$0xff]  ;;  %vm904_vm2 = vcmask 130048   ;;  %s1986_s14 = smov 96   ;;  %vm1623_vm3 = vcmask 7168  }
   0x2   :  { %1891 = vset.pattern.permute.xlu0 %v1982_v2  ;;  %1742 = vmatprep.subr.bf16.mxu1 %v1980_v0  ;;  %v46_v4 = vld [vmem:[%s2593_s0] sm:$0xff]  ;;  %v47_v24 = vld [vmem:[%s2593_s0 + $0x8] sm:$0xff] }
   0x3   :  { %1735 = vmatpush3.bf16.msra.mxu0 %v2061_v1  ;;  %1743 = vmatpush3.bf16.msra.mxu1 %v2061_v1  ;;  %v2096_v5 = vld [vmem:[%s2594_s2] ss:$0 sm:$0xff]  ;;  %s1984_s2 = smov 32  }
   0x4   :  { %1736 = vmatprep.subr.bf16.mxu0 %v1980_v0  ;;  %57 = vperm.xlu0 %1891, %v46_v4   ;;  %v2102_v8 = vld [vmem:[%s2595_s4] ss:$0 sm:$0xff] }
   0x5   :  { %1744 = vmatprep.subr.bf16.mxu1 %v1980_v0  ;;  %1746 = vmatprep.mubr.msk.bf16.mxu1 %vm1981_vm0, %v1980_v0 }
   0x6   :  { %1892 = vset.pattern.permute.xlu1 %v1982_v2 }
   0x7   :  { %1737 = vmatpush3.bf16.msra.mxu0 %v2071_v3  ;;  %1745 = vmatpush3.bf16.msra.mxu1 %v2071_v3 }
   0x8   :  { %1750 = vmatprep.subr.bf16.mxu0 %v1980_v0  ;;  %1758 = vmatprep.subr.bf16.mxu1 %v1980_v0 }
   0xa   :  { %1739 = vmatmul.mubr.bf16.vlgmr.msra.gmra.mrb[0].mxu0 %v1982_v2 }
   0xb   :  { %1751 = vmatpush3.bf16.msra.mxu0 %v2061_v1  ;;  %1754 = vmatprep.mubr.msk.bf16.mxu0 %vm1981_vm0, %v1980_v0 }
   0xc   :  { %1752 = vmatprep.subr.bf16.mxu0 %v1980_v0 }
   0xf   :  { %1753 = vmatpush3.bf16.msra.mxu0 %v2071_v3 }
  0x10   :  { %1766 = vmatprep.subr.bf16.mxu0 %v1980_v0 }
  0x83   :  { %v58_v6 = vpop.permute.xlu0 %57 }
  0x84   :  { %v101_v7 = vmul.f32 %v2096_v5, %v58_v6 }
  0x86   :  { %v116_v9 = vadd.f32 %v2102_v8, %v101_v7 }
  0xdd   :  { %v178_v10 = vpop.f32.mrb[0].mxu0 }
  0xde   :  { %v184_v11 = vadd.f32 %v178_v10, %v116_v9  ;;  %v1740_v12 = vpop.f32.mrb[1].mxu0  ;;  %v49_v10 = vld [vmem:[%s2593_s0 + $0x18] sm:$0xff] }
  0xdf   :  { %v181_v13 = vpop.f32.mrb[2].mxu0 }
  0xe0   :  { %1900 = vtanh.f32 %v184_v11  ;;  %v1741_v14 = vpop.f32.mrb[3].mxu0 }
  0xea   :  { %v1901_v15 = vpop.eup %1900 }
  0xeb   :  { %190 = vrot.lane.b32.xlu0 %v1901_v15, %s1983_s17  ;;  %v186_v16 = vadd.f32 1.0, %v1901_v15 }
  0xed   :  { %v187_v17 = vmul.f32 0.5, %v186_v16 }
  0xef   :  { %v188_v20 = vmul.f32 0.0, %v187_v17 }
 0x15d   :  { %v191_v18 = vpop.permute.xlu0 %190 }
 0x15e   :  { %v193_v19 = vmul.f32 %v191_v18, %v187_v17 }
 0x160   :  { %195 = vrot.lane.b32.xlu1 %v193_v19, %s1984_s2 }
 0x1d2   :  { %v196_v21 = vpop.permute.xlu1 %195 }
 0x1d3   :  { %v198_v22 = vadd.f32 %v196_v21, %v188_v20 }
 0x1d5   :  { %1902 = vtanh.f32 %v198_v22 }
 0x1df   :  { %v1903_v23 = vpop.eup %1902 }
 0x1e0   :  { %201 = vrot.lane.b32.xlu1 %v1903_v23, %s1983_s17 }
 0x1e4   :  { %62 = vperm.xlu1 %1892, %v47_v24  }
 0x252   :  { %v202_v25 = vpop.permute.xlu1 %201 }
 0x253   :  { %v2111_v26 = vmul.f32 %v202_v25, %v187_v17 }
 0x255   :  { %v205_v27 = vpack.c.bf16 %v2111_v26, %v2111_v26 }
 0x257   :  { %207 = vrot.lane.b32.xlu0 %v205_v27, %s1984_s2 }
 0x263   :  { %v63_v29 = vpop.permute.xlu1 %62 }
 0x264   :  { %v102_v30 = vmul.f32 %v2096_v5, %v63_v29 }
 0x266   :  { %v117_v31 = vadd.f32 %v2102_v8, %v102_v30 }
 0x2c9   :  { %v208_v28 = vpop.permute.xlu0 %207 }
 0x2ca   :  { %1747 = vmatmul.mubr.msk.bf16.vlgmr.msra.gmra.mrb[0].mxu1 %vm140_vm1, %v208_v28 }
 0x2cb   :  { %1759 = vmatpush3.bf16.msra.mxu1 %v2061_v1  ;;  %1762 = vmatprep.mubr.msk.bf16.mxu1 %vm1981_vm0, %v1980_v0 }
 0x2cc   :  { %1760 = vmatprep.subr.bf16.mxu1 %v1980_v0 }
 0x2cf   :  { %1761 = vmatpush3.bf16.msra.mxu1 %v2071_v3 }
 0x2d0   :  { %1774 = vmatprep.subr.bf16.mxu1 %v1980_v0 }
 0x39d   :  { %v246_v32 = vpop.f32.mrb[0].mxu1 }
 0x39e   :  { %v252_v33 = vadd.f32 %v246_v32, %v117_v31  ;;  %v1748_v34 = vpop.f32.mrb[1].mxu1 }
 0x39f   :  { %v249_v35 = vpop.f32.mrb[2].mxu1 }
 0x3a0   :  { %1904 = vtanh.f32 %v252_v33  ;;  %v1749_v36 = vpop.f32.mrb[3].mxu1  ;;  %v50_v33 = vld [vmem:[%s2593_s0 + $0x20] sm:$0xff] }
 0x3aa   :  { %v1905_v37 = vpop.eup %1904 }
 0x3ab   :  { %258 = vrot.lane.b32.xlu0 %v1905_v37, %s1983_s17  ;;  %v254_v38 = vadd.f32 1.0, %v1905_v37 }
 0x3ad   :  { %v255_v39 = vmul.f32 0.5, %v254_v38 }
 0x3af   :  { %v256_v42 = vmul.f32 %v255_v39, %v198_v22 }
 0x41d   :  { %v259_v40 = vpop.permute.xlu0 %258 }
 0x41e   :  { %v261_v41 = vmul.f32 %v259_v40, %v255_v39 }
 0x420   :  { %263 = vrot.lane.b32.xlu1 %v261_v41, %s1984_s2 }
 0x492   :  { %v264_v43 = vpop.permute.xlu1 %263 }
 0x493   :  { %v266_v44 = vadd.f32 %v264_v43, %v256_v42 }
 0x495   :  { %1906 = vtanh.f32 %v266_v44 }
 0x49f   :  { %v1907_v45 = vpop.eup %1906 }
 0x4a0   :  { %269 = vrot.lane.b32.xlu0 %v1907_v45, %s1983_s17 }
 0x4a4   :  { %67 = vperm.xlu0 %1891, %v48_v46  }
 0x512   :  { %v270_v47 = vpop.permute.xlu0 %269 }
 0x513   :  { %v2131_v48 = vmul.f32 %v270_v47, %v255_v39 }
 0x515   :  { %v273_v49 = vpack.c.bf16 %v2131_v48, %v2131_v48 }
 0x517   :  { %275 = vrot.lane.b32.xlu1 %v273_v49, %s1984_s2 }
 0x523   :  { %v68_v51 = vpop.permute.xlu0 %67 }
 0x524   :  { %v103_v52 = vmul.f32 %v2096_v5, %v68_v51 }
 0x526   :  { %v118_v53 = vadd.f32 %v2102_v8, %v103_v52 }
 0x589   :  { %v276_v50 = vpop.permute.xlu1 %275 }
 0x58a   :  { %1755 = vmatmul.mubr.msk.bf16.vlgmr.msra.gmra.mrb[4].mxu0 %vm140_vm1, %v276_v50 }
 0x58b   :  { %1767 = vmatpush3.bf16.msra.mxu0 %v2061_v1  ;;  %1770 = vmatprep.mubr.msk.bf16.mxu0 %vm1981_vm0, %v1980_v0 }
 0x58c   :  { %1768 = vmatprep.subr.bf16.mxu0 %v1980_v0 }
 0x58f   :  { %1769 = vmatpush3.bf16.msra.mxu0 %v2071_v3 }
 0x590   :  { %1782 = vmatprep.subr.bf16.mxu0 %v1980_v0 }
 0x65d   :  { %v314_v54 = vpop.f32.mrb[4].mxu0 }
 0x65e   :  { %v320_v55 = vadd.f32 %v314_v54, %v118_v53  ;;  %v1756_v56 = vpop.f32.mrb[5].mxu0 }
 0x65f   :  { %v317_v57 = vpop.f32.mrb[6].mxu0  ;;  %v51_v56 = vld [vmem:[%s2593_s0 + $0x28] sm:$0xff] }
 0x660   :  { %1908 = vtanh.f32 %v320_v55  ;;  %v1757_v58 = vpop.f32.mrb[7].mxu0 }
 0x66a   :  { %v1909_v59 = vpop.eup %1908 }
 0x66b   :  { %326 = vrot.lane.b32.xlu1 %v1909_v59, %s1983_s17  ;;  %v322_v60 = vadd.f32 1.0, %v1909_v59 }
 0x66d   :  { %v323_v61 = vmul.f32 0.5, %v322_v60 }
 0x66f   :  { %v324_v4 = vmul.f32 %v323_v61, %v266_v44 }
 0x6dd   :  { %v327_v62 = vpop.permute.xlu1 %326 }
 0x6de   :  { %v329_v63 = vmul.f32 %v327_v62, %v323_v61 }
 0x6e0   :  { %331 = vrot.lane.b32.xlu0 %v329_v63, %s1984_s2 }
 0x752   :  { %v332_v6 = vpop.permute.xlu0 %331 }
 0x753   :  { %v334_v7 = vadd.f32 %v332_v6, %v324_v4 }
 0x755   :  { %1910 = vtanh.f32 %v334_v7 }
 0x75f   :  { %v1911_v9 = vpop.eup %1910 }
 0x760   :  { %337 = vrot.lane.b32.xlu1 %v1911_v9, %s1983_s17 }
 0x764   :  { %72 = vperm.xlu1 %1892, %v49_v10  }
 0x7d2   :  { %v338_v11 = vpop.permute.xlu1 %337 }
 0x7d3   :  { %v2151_v12 = vmul.f32 %v338_v11, %v323_v61 }
 0x7d5   :  { %v341_v13 = vpack.c.bf16 %v2151_v12, %v2151_v12 }
 0x7d7   :  { %343 = vrot.lane.b32.xlu0 %v341_v13, %s1984_s2 }
 0x7e3   :  { %v73_v15 = vpop.permute.xlu1 %72 }
 0x7e4   :  { %v104_v16 = vmul.f32 %v2096_v5, %v73_v15 }
 0x7e6   :  { %v119_v17 = vadd.f32 %v2102_v8, %v104_v16 }
 0x849   :  { %v344_v14 = vpop.permute.xlu0 %343 }
 0x84a   :  { %1763 = vmatmul.mubr.msk.bf16.vlgmr.msra.gmra.mrb[4].mxu1 %vm140_vm1, %v344_v14 }
 0x84b   :  { %1775 = vmatpush3.bf16.msra.mxu1 %v2061_v1  ;;  %1778 = vmatprep.mubr.msk.bf16.mxu1 %vm1981_vm0, %v1980_v0 }
 0x84c   :  { %1776 = vmatprep.subr.bf16.mxu1 %v1980_v0 }
 0x84f   :  { %1777 = vmatpush3.bf16.msra.mxu1 %v2071_v3 }
 0x850   :  { %1790 = vmatprep.subr.bf16.mxu1 %v1980_v0 }
 0x91d   :  { %v382_v18 = vpop.f32.mrb[4].mxu1 }
 0x91e   :  { %v388_v19 = vadd.f32 %v382_v18, %v119_v17  ;;  %v1764_v20 = vpop.f32.mrb[5].mxu1 }
 0x91f   :  { %v385_v21 = vpop.f32.mrb[6].mxu1 }
 0x920   :  { %1912 = vtanh.f32 %v388_v19  ;;  %v1765_v22 = vpop.f32.mrb[7].mxu1  ;;  %v52_v19 = vld [vmem:[%s2593_s0 + $0x30] sm:$0xff] }
 0x92a   :  { %v1913_v23 = vpop.eup %1912 }
 0x92b   :  { %394 = vrot.lane.b32.xlu0 %v1913_v23, %s1983_s17  ;;  %v390_v24 = vadd.f32 1.0, %v1913_v23 }
 0x92d   :  { %v391_v25 = vmul.f32 0.5, %v390_v24 }
 0x92f   :  { %v392_v29 = vmul.f32 %v391_v25, %v334_v7 }
 0x99d   :  { %v395_v27 = vpop.permute.xlu0 %394 }
 0x99e   :  { %v397_v28 = vmul.f32 %v395_v27, %v391_v25 }
 0x9a0   :  { %399 = vrot.lane.b32.xlu1 %v397_v28, %s1984_s2 }
 0xa12   :  { %v400_v30 = vpop.permute.xlu1 %399 }
 0xa13   :  { %v402_v31 = vadd.f32 %v400_v30, %v392_v29 }
 0xa15   :  { %1914 = vtanh.f32 %v402_v31 }
 0xa1f   :  { %v1915_v32 = vpop.eup %1914 }
 0xa20   :  { %405 = vrot.lane.b32.xlu0 %v1915_v32, %s1983_s17 }
 0xa24   :  { %77 = vperm.xlu0 %1891, %v50_v33  }
 0xa92   :  { %v406_v34 = vpop.permute.xlu0 %405 }
 0xa93   :  { %v2171_v35 = vmul.f32 %v406_v34, %v391_v25 }
 0xa95   :  { %v409_v36 = vpack.c.bf16 %v2171_v35, %v2171_v35 }
 0xa97   :  { %411 = vrot.lane.b32.xlu1 %v409_v36, %s1984_s2 }
 0xaa3   :  { %v78_v38 = vpop.permute.xlu0 %77 }
 0xaa4   :  { %v105_v39 = vmul.f32 %v2096_v5, %v78_v38 }
 0xaa6   :  { %v120_v40 = vadd.f32 %v2102_v8, %v105_v39 }
 0xb09   :  { %v412_v37 = vpop.permute.xlu1 %411 }
 0xb0a   :  { %1771 = vmatmul.mubr.msk.bf16.vlgmr.msra.gmra.mrb[8].mxu0 %vm140_vm1, %v412_v37 }
 0xb0b   :  { %1783 = vmatpush3.bf16.msra.mxu0 %v2061_v1  ;;  %1786 = vmatprep.mubr.msk.bf16.mxu0 %vm1981_vm0, %v1980_v0 }
 0xb0c   :  { %1784 = vmatprep.subr.bf16.mxu0 %v1980_v0 }
 0xb0f   :  { %1785 = vmatpush3.bf16.msra.mxu0 %v2071_v3 }
 0xbdd   :  { %v450_v41 = vpop.f32.mrb[8].mxu0 }
 0xbde   :  { %v456_v42 = vadd.f32 %v450_v41, %v120_v40  ;;  %v1772_v43 = vpop.f32.mrb[9].mxu0 }
 0xbdf   :  { %v453_v44 = vpop.f32.mrb[10].mxu0  ;;  %v681_v43 = vpack.c.bf16 %v2131_v48, %v2111_v26 }
 0xbe0   :  { %1916 = vtanh.f32 %v456_v42  ;;  %v1773_v45 = vpop.f32.mrb[11].mxu0  ;;  %v53_v44 = vld [vmem:[%s2593_s0 + $0x38] sm:$0xff] }
 0xbe1   :  { %v1895_v45 = vld [vmem:[%s2596_s5] sm:$0xff]  }
 0xbe2   :  { %1798 = vmatprep.subr.bf16.mxu0 %v1895_v45 }
 0xbea   :  { %v1917_v46 = vpop.eup %1916 }
 0xbeb   :  { %462 = vrot.lane.b32.xlu1 %v1917_v46, %s1983_s17  ;;  %v458_v47 = vadd.f32 1.0, %v1917_v46  ;;  %v1896_v46 = vld [vmem:[%s2596_s5 + $0x8] sm:$0xff]  }
 0xbed   :  { %v459_v49 = vmul.f32 0.5, %v458_v47 }
 0xbef   :  { %v460_v52 = vmul.f32 %v459_v49, %v402_v31 }
 0xc5d   :  { %v463_v50 = vpop.permute.xlu1 %462 }
 0xc5e   :  { %v465_v51 = vmul.f32 %v463_v50, %v459_v49  ;;  %v682_v50 = vpack.c.bf16 %v2171_v35, %v2151_v12  ;;  %v2252_v12 = vld [vmem:[%s2597_s6] ss:$0 sm:$0xff] }
 0xc60   :  { %467 = vrot.lane.b32.xlu0 %v465_v51, %s1984_s2 }
 0xcd2   :  { %v468_v53 = vpop.permute.xlu0 %467 }
 0xcd3   :  { %v470_v54 = vadd.f32 %v468_v53, %v460_v52 }
 0xcd5   :  { %1918 = vtanh.f32 %v470_v54 }
 0xcdf   :  { %v1919_v55 = vpop.eup %1918 }
 0xce0   :  { %473 = vrot.lane.b32.xlu1 %v1919_v55, %s1983_s17 }
 0xce4   :  { %82 = vperm.xlu1 %1892, %v51_v56  }
 0xd52   :  { %v474_v57 = vpop.permute.xlu1 %473 }
 0xd53   :  { %v2190_v58 = vmul.f32 %v474_v57, %v459_v49 }
 0xd55   :  { %v477_v59 = vpack.c.bf16 %v2190_v58, %v2190_v58 }
 0xd57   :  { %479 = vrot.lane.b32.xlu0 %v477_v59, %s1984_s2 }
 0xd63   :  { %v83_v61 = vpop.permute.xlu1 %82 }
 0xd64   :  { %v106_v62 = vmul.f32 %v2096_v5, %v83_v61 }
 0xd66   :  { %v121_v63 = vadd.f32 %v2102_v8, %v106_v62 }
 0xdc9   :  { %v480_v60 = vpop.permute.xlu0 %479 }
 0xdca   :  { %1779 = vmatmul.mubr.msk.bf16.vlgmr.msra.gmra.mrb[8].mxu1 %vm140_vm1, %v480_v60 }
 0xdcb   :  { %1791 = vmatpush3.bf16.msra.mxu1 %v2061_v1  ;;  %1794 = vmatprep.mubr.msk.bf16.mxu1 %vm1981_vm0, %v1980_v0 }
 0xdcc   :  { %1792 = vmatprep.subr.bf16.mxu1 %v1980_v0 }
 0xdcf   :  { %1793 = vmatpush3.bf16.msra.mxu1 %v2071_v3 }
 0xe9d   :  { %v518_v4 = vpop.f32.mrb[8].mxu1 }
 0xe9e   :  { %v524_v6 = vadd.f32 %v518_v4, %v121_v63  ;;  %v1780_v7 = vpop.f32.mrb[9].mxu1 }
 0xe9f   :  { %v521_v9 = vpop.f32.mrb[10].mxu1 }
 0xea0   :  { %1920 = vtanh.f32 %v524_v6  ;;  %v1781_v10 = vpop.f32.mrb[11].mxu1 }
 0xeaa   :  { %v1921_v11 = vpop.eup %1920 }
 0xeab   :  { %530 = vrot.lane.b32.xlu0 %v1921_v11, %s1983_s17  ;;  %v526_v1 = vadd.f32 1.0, %v1921_v11 }
 0xead   :  { %v527_v13 = vmul.f32 0.5, %v526_v1 }
 0xeaf   :  { %v528_v3 = vmul.f32 %v527_v13, %v470_v54 }
 0xf1d   :  { %v531_v14 = vpop.permute.xlu0 %530 }
 0xf1e   :  { %v533_v15 = vmul.f32 %v531_v14, %v527_v13 }
 0xf20   :  { %535 = vrot.lane.b32.xlu1 %v533_v15, %s1984_s2 }
 0xf92   :  { %v536_v16 = vpop.permute.xlu1 %535 }
 0xf93   :  { %v538_v17 = vadd.f32 %v536_v16, %v528_v3 }
 0xf95   :  { %1922 = vtanh.f32 %v538_v17 }
 0xf9f   :  { %v1923_v18 = vpop.eup %1922 }
 0xfa0   :  { %541 = vrot.lane.b32.xlu0 %v1923_v18, %s1983_s17 }
 0xfa4   :  { %87 = vperm.xlu0 %1891, %v52_v19  }
0x1012   :  { %v542_v20 = vpop.permute.xlu0 %541 }
0x1013   :  { %v2209_v21 = vmul.f32 %v542_v20, %v527_v13 }
0x1015   :  { %v545_v22 = vpack.c.bf16 %v2209_v21, %v2209_v21  ;;  %v683_v18 = vpack.c.bf16 %v2209_v21, %v2190_v58  ;;  %v1897_v58 = vld [vmem:[%s2599_s7] sm:$0xff]  }
0x1016   :  { %1810 = vmatprep.subr.bf16.mxu1 %v1897_v58 }
0x1017   :  { %547 = vrot.lane.b32.xlu1 %v545_v22, %s1984_s2 }
0x1023   :  { %v88_v24 = vpop.permute.xlu0 %87 }
0x1024   :  { %v107_v25 = vmul.f32 %v2096_v5, %v88_v24 }
0x1026   :  { %v122_v27 = vadd.f32 %v2102_v8, %v107_v25 }
0x1089   :  { %v548_v23 = vpop.permute.xlu1 %547 }
0x108a   :  { %1787 = vmatmul.mubr.msk.bf16.vlgmr.msra.gmra.mrb[12].mxu0 %vm140_vm1, %v548_v23 }
0x108b   :  { %1799 = vmatpush3.bf16.msra.mxu0 %v1895_v45 }
0x108c   :  { %1800 = vmatprep.subr.bf16.mxu0 %v1896_v46 }
0x108f   :  { %1801 = vmatpush3.bf16.msra.mxu0 %v1896_v46  ;;  %v807_v46 = vld [vmem:[%s2601_s1 + $0x10] sm:$0xff] }
0x1090   :  { %1820 = vmatprep.subr.bf16.mxu0 %v1980_v0 }
0x115d   :  { %v586_v28 = vpop.f32.mrb[12].mxu0 }
0x115e   :  { %v592_v29 = vadd.f32 %v586_v28, %v122_v27  ;;  %v1788_v30 = vpop.f32.mrb[13].mxu0 }
0x115f   :  { %v589_v31 = vpop.f32.mrb[14].mxu0 }
0x1160   :  { %1924 = vtanh.f32 %v592_v29  ;;  %v1789_v32 = vpop.f32.mrb[15].mxu0  ;;  %v2307_v31 = vld [vmem:[%s2600_s8] sm:$0xff]  }
0x116a   :  { %v1925_v33 = vpop.eup %1924 }
0x116b   :  { %598 = vrot.lane.b32.xlu1 %v1925_v33, %s1983_s17  ;;  %v594_v34 = vadd.f32 1.0, %v1925_v33 }
0x116d   :  { %v595_v36 = vmul.f32 0.5, %v594_v34  ;;  %v2316_v34 = vld [vmem:[%s2600_s8 + $0x8] sm:$0xff]  }
0x116f   :  { %v596_v39 = vmul.f32 %v595_v36, %v538_v17 }
0x11dd   :  { %v599_v37 = vpop.permute.xlu1 %598 }
0x11de   :  { %v601_v38 = vmul.f32 %v599_v37, %v595_v36 }
0x11e0   :  { %603 = vrot.lane.b32.xlu0 %v601_v38, %s1984_s2 }
0x1252   :  { %v604_v40 = vpop.permute.xlu0 %603 }
0x1253   :  { %v2219_v41 = vadd.f32 %v604_v40, %v596_v39  ;;  %v806_v39 = vld [vmem:[%s2601_s1 + $0x8] sm:$0xff] }
0x1255   :  { %1926 = vtanh.f32 %v2219_v41 }
0x125f   :  { %v1927_v42 = vpop.eup %1926 }
0x1260   :  { %609 = vrot.lane.b32.xlu1 %v1927_v42, %s1983_s17  ;;  %v808_v42 = vld [vmem:[%s2601_s1 + $0x18] sm:$0xff] }
0x1264   :  { %700 = vrot.lane.b32.xlu1 %v681_v43, %s1984_s2 }
0x1268   :  { %92 = vperm.xlu1 %1892, %v53_v44  }
0x12d2   :  { %v610_v26 = vpop.permute.xlu1 %609 }
0x12d3   :  { %v2236_v48 = vmul.f32 %v610_v26, %v595_v36  ;;  %v805_v36 = vld [vmem:[%s2601_s1] sm:$0xff] }
0x12d5   :  { %v613_v47 = vpack.c.bf16 %v2236_v48, %v2236_v48 }
0x12d6   :  { %v701_v49 = vpop.permute.xlu1 %700 }
0x12d7   :  { %615 = vrot.lane.b32.xlu0 %v613_v47, %s1984_s2  ;;  %1802 = vmatprep.mubr.msk.bf16.mxu0 %vm140_vm1, %v701_v49 }
0x12db   :  { %702 = vrot.lane.b32.xlu0 %v682_v50, %s1984_s2 }
0x12e7   :  { %v93_v53 = vpop.permute.xlu1 %92 }
0x12e8   :  { %v108_v54 = vmul.f32 %v2096_v5, %v93_v53 }
0x12ea   :  { %v123_v55 = vadd.f32 %v2102_v8, %v108_v54 }
0x1349   :  { %v616_v51 = vpop.permute.xlu0 %615 }
0x134a   :  { %1795 = vmatmul.mubr.msk.bf16.vlgmr.msra.gmra.mrb[12].mxu1 %vm140_vm1, %v616_v51 }
0x134b   :  { %1811 = vmatpush3.bf16.msra.mxu1 %v1897_v58 }
0x134c   :  { %1828 = vmatprep.subr.bf16.mxu1 %v1980_v0 }
0x134d   :  { %v703_v52 = vpop.permute.xlu0 %702 }
0x134e   :  { %1803 = vmatmul.mubr.msk.bf16.vlgmr.msra.gmra.mrb[16].mxu0 %vm140_vm1, %v703_v52 }
0x134f   :  { %1821 = vmatpush3.bf16.msra.mxu0 %v2307_v31 }
0x1350   :  { %1822 = vmatprep.subr.bf16.mxu0 %v1980_v0 }
0x1353   :  { %1823 = vmatpush3.bf16.msra.mxu0 %v2316_v34 }
0x1354   :  { %1836 = vmatprep.subr.bf16.mxu0 %v1980_v0 }
0x141d   :  { %v654_v56 = vpop.f32.mrb[12].mxu1 }
0x141e   :  { %v660_v57 = vadd.f32 %v654_v56, %v123_v55  ;;  %v1796_v59 = vpop.f32.mrb[13].mxu1 }
0x141f   :  { %v657_v60 = vpop.f32.mrb[14].mxu1 }
0x1420   :  { %1928 = vtanh.f32 %v660_v57  ;;  %v1797_v35 = vpop.f32.mrb[15].mxu1 }
0x1421   :  { %v1804_v61 = vpop.f32.mrb[16].mxu0 }
0x1422   :  { %v2255_v62 = vadd.f32 %v1804_v61, %v2252_v12  ;;  %v766_v63 = vpop.f32.mrb[17].mxu0 }
0x1423   :  { %v2258_v5 = vadd.f32 %v2252_v12, %v766_v63  ;;  %v1805_v8 = vpop.f32.mrb[18].mxu0 }
0x1424   :  { %799 = vst.msk [vmem:[%s2598_s13 + $0x10] sm:$0xff] %vm140_vm1, %v2255_v62  ;;  %v2266_v4 = vadd.f32 %v1805_v8, %v2252_v12  ;;  %v769_v6 = vpop.f32.mrb[19].mxu0  ;;  %v815_v25 = vmul.f32 0.5, %v2255_v62 }
0x1425   :  { %797 = vst.msk [vmem:[%s2598_s13] sm:$0xff] %vm140_vm1, %v2258_v5  ;;  %v2274_v7 = vadd.f32 %v2252_v12, %v769_v6  ;;  %v813_v10 = vmul.f32 0.5, %v2258_v5 }
0x1426   :  { %800 = vst.msk [vmem:[%s2598_s13 + $0x18] sm:$0xff] %vm140_vm1, %v2266_v4  ;;  %v816_v13 = vmul.f32 0.5, %v2266_v4  ;;  %v825_v29 = vmul.f32 1.442695, %v815_v25 }
0x1427   :  { %798 = vst.msk [vmem:[%s2598_s13 + $0x8] sm:$0xff] %vm140_vm1, %v2274_v7  ;;  %v821_v11 = vmul.f32 1.442695, %v813_v10  ;;  %v814_v20 = vmul.f32 0.5, %v2274_v7 }
0x1428   :  { %v827_v15 = vmul.f32 1.442695, %v816_v13 }
0x1429   :  { %1930 = vpow2.f32 %v821_v11  ;;  %v823_v27 = vmul.f32 1.442695, %v814_v20 }
0x142a   :  { %v1929_v9 = vpop.eup %1928  ;;  %1932 = vpow2.f32 %v827_v15 }
0x142b   :  { %666 = vrot.lane.b32.xlu0 %v1929_v9, %s1983_s17  ;;  %v662_v1 = vadd.f32 1.0, %v1929_v9 }
0x142d   :  { %v663_v14 = vmul.f32 0.5, %v662_v1 }
0x142f   :  { %v664_v22 = vmul.f32 %v663_v14, %v2219_v41 }
0x1433   :  { %v1931_v17 = vpop.eup %1930 }
0x1434   :  { %v1933_v19 = vpop.eup %1932 }
0x149d   :  { %v667_v3 = vpop.permute.xlu0 %666 }
0x149e   :  { %v669_v16 = vmul.f32 %v667_v3, %v663_v14 }
0x14a0   :  { %671 = vrot.lane.b32.xlu1 %v669_v16, %s1984_s2 }
0x14a4   :  { %845 = vrot.lane.b32.xlu1 %v1931_v17, %s1985_s24 }
0x14a8   :  { %704 = vrot.lane.b32.xlu1 %v683_v18, %s1984_s2 }
0x14ac   :  { %851 = vrot.lane.b32.xlu1 %v1933_v19, %s1985_s24 }
0x1512   :  { %v672_v23 = vpop.permute.xlu1 %671 }
0x1513   :  { %v674_v24 = vadd.f32 %v672_v23, %v664_v22 }
0x1515   :  { %1934 = vtanh.f32 %v674_v24 }
0x1516   :  { %v846_v28 = vpop.permute.xlu1 %845  ;;  %1936 = vpow2.f32 %v823_v27 }
0x1517   :  { %1938 = vpow2.f32 %v825_v29  ;;  %v869_v40 = vmul.f32 %v846_v28, %v805_v36 }
0x1519   :  { %v877_v26 = vadd.f32 %v869_v40, %v2258_v5  ;;  %v810_v40 = vld [vmem:[%s2601_s1 + $0x28] sm:$0xff] }
0x151a   :  { %v705_v30 = vpop.permute.xlu1 %704 }
0x151b   :  { %1806 = vmatprep.mubr.msk.bf16.mxu0 %vm140_vm1, %v705_v30 }
0x151e   :  { %v852_v43 = vpop.permute.xlu1 %851 }
0x151f   :  { %v1935_v21 = vpop.eup %1934  ;;  %v872_v47 = vmul.f32 %v852_v43, %v808_v42  ;;  %v811_v43 = vld [vmem:[%s2601_s1 + $0x30] sm:$0xff] }
0x1520   :  { %677 = vrot.lane.b32.xlu0 %v1935_v21, %s1983_s17  ;;  %v1937_v32 = vpop.eup %1936 }
0x1521   :  { %v1939_v33 = vpop.eup %1938  ;;  %v880_v52 = vadd.f32 %v872_v47, %v2266_v4  ;;  %v2377_v4 = vld [vmem:[%s2602_s9] ss:$0 sm:$0xff] }
0x1524   :  { %847 = vrot.lane.b32.xlu0 %v1937_v32, %s1985_s24 }
0x1528   :  { %849 = vrot.lane.b32.xlu0 %v1939_v33, %s1985_s24 }
0x1592   :  { %v678_v37 = vpop.permute.xlu0 %677 }
0x1593   :  { %v680_v38 = vmul.f32 %v678_v37, %v663_v14  ;;  %v809_v37 = vld [vmem:[%s2601_s1 + $0x20] sm:$0xff] }
0x1595   :  { %v684_v41 = vpack.c.bf16 %v680_v38, %v2236_v48 }
0x1596   :  { %v848_v44 = vpop.permute.xlu0 %847 }
0x1597   :  { %v870_v45 = vmul.f32 %v848_v44, %v806_v39  ;;  %706 = vrot.lane.b32.xlu0 %v684_v41, %s1984_s2 }
0x1599   :  { %v878_v49 = vadd.f32 %v870_v45, %v2274_v7 }
0x159a   :  { %v850_v50 = vpop.permute.xlu0 %849 }
0x159b   :  { %v885_v48 = vpack.c.bf16 %v878_v49, %v877_v26  ;;  %v871_v51 = vmul.f32 %v850_v50, %v807_v46  ;;  %v812_v26 = vld [vmem:[%s2601_s1 + $0x38] sm:$0xff] }
0x159d   :  { %v879_v53 = vadd.f32 %v871_v51, %v2255_v62  ;;  %1812 = vmatprep.mubr.msk.bf16.mxu1 %vm904_vm2, %v885_v48 }
0x159f   :  { %v886_v54 = vpack.c.bf16 %v880_v52, %v879_v53 }
0x15a1   :  { %1813 = vmatmul.mubr.msk.bf16.vlgmr.msra.gmra.mrb[16].mxu1 %vm904_vm2, %v886_v54 }
0x15a2   :  { %1829 = vmatpush3.bf16.msra.mxu1 %v2307_v31 }
0x15a3   :  { %1830 = vmatprep.subr.bf16.mxu1 %v1980_v0 }
0x15a6   :  { %1831 = vmatpush3.bf16.msra.mxu1 %v2316_v34 }
0x15a7   :  { %1844 = vmatprep.subr.bf16.mxu1 %v1980_v0 }
0x1609   :  { %v707_v55 = vpop.permute.xlu0 %706 }
0x160a   :  { %1807 = vmatmul.mubr.msk.bf16.gmra.mrb[20].mxu0 %vm140_vm1, %v707_v55 }
0x160b   :  { %1824 = vmatprep.mubr.msk.bf16.mxu0 %vm1981_vm0, %v1980_v0 }
0x1612   :  { %1825 = vmatmul.mubr.bf16.vlgmr.msra.gmra.mrb[24].mxu0 %v1982_v2 }
0x1613   :  { %1837 = vmatpush3.bf16.msra.mxu0 %v2307_v31  ;;  %1840 = vmatprep.mubr.msk.bf16.mxu0 %vm1981_vm0, %v1980_v0 }
0x1614   :  { %1838 = vmatprep.subr.bf16.mxu0 %v1980_v0 }
0x1617   :  { %1839 = vmatpush3.bf16.msra.mxu0 %v2316_v34 }
0x1618   :  { %1852 = vmatprep.subr.bf16.mxu0 %v1980_v0 }
0x1674   :  { %v2354_v56 = vpop.f32.mrb[16].mxu1 }
0x1675   :  { %v951_v57 = vpop.f32.mrb[17].mxu1 }
0x1676   :  { %v2356_v59 = vpop.f32.mrb[18].mxu1  ;;  %v952_v7 = vadd.f32 %v2377_v4, %v951_v57 }
0x1677   :  { %v2358_v60 = vpop.f32.mrb[19].mxu1 }
0x16dd   :  { %v1808_v35 = vpop.f32.mrb[20].mxu0 }
0x16de   :  { %v2361_v2 = vadd.f32 %v1808_v35, %v2252_v12  ;;  %v782_v61 = vpop.f32.mrb[21].mxu0 }
0x16df   :  { %v2364_v62 = vadd.f32 %v2252_v12, %v782_v61  ;;  %v1809_v63 = vpop.f32.mrb[22].mxu0 }
0x16e0   :  { %803 = vst.msk [vmem:[%s2598_s13 + $0x30] sm:$0xff] %vm140_vm1, %v2361_v2  ;;  %v2372_v5 = vadd.f32 %v1809_v63, %v2252_v12  ;;  %v785_v8 = vpop.f32.mrb[23].mxu0  ;;  %v819_v15 = vmul.f32 0.5, %v2361_v2  ;;  %v955_v63 = vadd.f32 %v2377_v4, %v2358_v60 }
0x16e1   :  { %801 = vst.msk [vmem:[%s2598_s13 + $0x20] sm:$0xff] %vm140_vm1, %v2364_v62  ;;  %v786_v6 = vadd.f32 %v2252_v12, %v785_v8  ;;  %v817_v14 = vmul.f32 0.5, %v2364_v62 }
0x16e2   :  { %804 = vst.msk [vmem:[%s2598_s13 + $0x38] sm:$0xff] %vm140_vm1, %v2372_v5  ;;  %v833_v17 = vmul.f32 1.442695, %v819_v15  ;;  %v820_v29 = vmul.f32 0.5, %v2372_v5 }
0x16e3   :  { %802 = vst.msk [vmem:[%s2598_s13 + $0x28] sm:$0xff] %vm140_vm1, %v786_v6  ;;  %v829_v3 = vmul.f32 1.442695, %v817_v14  ;;  %v818_v24 = vmul.f32 0.5, %v786_v6 }
0x16e4   :  { %v835_v58 = vmul.f32 1.442695, %v820_v29 }
0x16e5   :  { %v1032_v9 = vpop.f32.mrb[24].mxu0  ;;  %v831_v30 = vmul.f32 1.442695, %v818_v24 }
0x16e6   :  { %v1038_v10 = vadd.f32 %v1032_v9, %v952_v7  ;;  %v1826_v11 = vpop.f32.mrb[25].mxu0 }
0x16e7   :  { %v1035_v1 = vpop.f32.mrb[26].mxu0 }
0x16e8   :  { %1940 = vtanh.f32 %v1038_v10  ;;  %v1827_v13 = vpop.f32.mrb[27].mxu0 }
0x16e9   :  { %1942 = vpow2.f32 %v829_v3 }
0x16ea   :  { %1944 = vpow2.f32 %v833_v17 }
0x16f2   :  { %v1941_v12 = vpop.eup %1940 }
0x16f3   :  { %1044 = vrot.lane.b32.xlu1 %v1941_v12, %s1983_s17  ;;  %v1040_v16 = vadd.f32 1.0, %v1941_v12  ;;  %v1943_v22 = vpop.eup %1942 }
0x16f4   :  { %v1945_v23 = vpop.eup %1944 }
0x16f5   :  { %v1041_v18 = vmul.f32 0.5, %v1040_v16 }
0x16f7   :  { %v1042_v25 = vmul.f32 0.0, %v1041_v18 }
0x1765   :  { %v1045_v19 = vpop.permute.xlu1 %1044 }
0x1766   :  { %v1047_v20 = vmul.f32 %v1045_v19, %v1041_v18 }
0x1768   :  { %1049 = vrot.lane.b32.xlu0 %v1047_v20, %s1984_s2  ;;  %v960_v20 = vadd.f32 %v2354_v56, %v2377_v4 }
0x176c   :  { %853 = vrot.lane.b32.xlu0 %v1943_v22, %s1985_s24 }
0x1770   :  { %857 = vrot.lane.b32.xlu0 %v1945_v23, %s1985_s24 }
0x17da   :  { %v1050_v27 = vpop.permute.xlu0 %1049 }
0x17db   :  { %v2401_v28 = vadd.f32 %v1050_v27, %v1042_v25 }
0x17dd   :  { %1946 = vtanh.f32 %v2401_v28 }
0x17de   :  { %1948 = vpow2.f32 %v831_v30  ;;  %v854_v36 = vpop.permute.xlu0 %853 }
0x17df   :  { %1950 = vpow2.f32 %v835_v58  ;;  %v873_v41 = vmul.f32 %v854_v36, %v809_v37 }
0x17e1   :  { %v881_v47 = vadd.f32 %v873_v41, %v2364_v62 }
0x17e2   :  { %v858_v44 = vpop.permute.xlu0 %857 }
0x17e3   :  { %v875_v49 = vmul.f32 %v858_v44, %v811_v43 }
0x17e5   :  { %v883_v53 = vadd.f32 %v875_v49, %v2361_v2 }
0x17e7   :  { %v1947_v21 = vpop.eup %1946 }
0x17e8   :  { %1055 = vrot.lane.b32.xlu1 %v1947_v21, %s1983_s17  ;;  %v1949_v32 = vpop.eup %1948 }
0x17e9   :  { %v1951_v33 = vpop.eup %1950 }
0x17ec   :  { %855 = vrot.lane.b32.xlu1 %v1949_v32, %s1985_s24 }
0x17f0   :  { %859 = vrot.lane.b32.xlu1 %v1951_v33, %s1985_s24 }
0x185a   :  { %v1056_v38 = vpop.permute.xlu1 %1055 }
0x185b   :  { %v2411_v39 = vmul.f32 %v1056_v38, %v1041_v18 }
0x185d   :  { %v1059_v42 = vpack.c.bf16 %v2411_v39, %v2411_v39 }
0x185e   :  { %v856_v45 = vpop.permute.xlu1 %855 }
0x185f   :  { %v874_v46 = vmul.f32 %v856_v45, %v810_v40  ;;  %1061 = vrot.lane.b32.xlu0 %v1059_v42, %s1984_s2  ;;  %v963_v42 = vadd.f32 %v2356_v59, %v2377_v4 }
0x1861   :  { %v882_v50 = vadd.f32 %v874_v46, %v786_v6 }
0x1862   :  { %v860_v48 = vpop.permute.xlu1 %859 }
0x1863   :  { %v887_v51 = vpack.c.bf16 %v882_v50, %v881_v47  ;;  %v876_v52 = vmul.f32 %v860_v48, %v812_v26 }
0x1865   :  { %v884_v54 = vadd.f32 %v876_v52, %v2372_v5  ;;  %1816 = vmatprep.mubr.msk.bf16.mxu1 %vm904_vm2, %v887_v51 }
0x1867   :  { %v888_v55 = vpack.c.bf16 %v884_v54, %v883_v53 }
0x1869   :  { %1817 = vmatmul.mubr.msk.bf16.gmra.mrb[20].mxu1 %vm904_vm2, %v888_v55 }
0x186a   :  { %1832 = vmatprep.mubr.msk.bf16.mxu1 %vm1981_vm0, %v1980_v0 }
0x18d1   :  { %v1062_v57 = vpop.permute.xlu0 %1061 }
0x18d2   :  { %1833 = vmatmul.mubr.msk.bf16.vlgmr.msra.gmra.mrb[24].mxu1 %vm140_vm1, %v1062_v57 }
0x18d3   :  { %1845 = vmatpush3.bf16.msra.mxu1 %v2307_v31  ;;  %1848 = vmatprep.mubr.msk.bf16.mxu1 %vm1981_vm0, %v1980_v0 }
0x18d4   :  { %1846 = vmatprep.subr.bf16.mxu1 %v1980_v0 }
0x18d7   :  { %1847 = vmatpush3.bf16.msra.mxu1 %v2316_v34 }
0x18d8   :  { %1860 = vmatprep.subr.bf16.mxu1 %v1980_v0 }
0x193c   :  { %v2439_v35 = vpop.f32.mrb[20].mxu1 }
0x193d   :  { %v2441_v2 = vpop.f32.mrb[21].mxu1 }
0x193e   :  { %v2443_v61 = vpop.f32.mrb[22].mxu1 }
0x193f   :  { %v2445_v62 = vpop.f32.mrb[23].mxu1 }
0x19a5   :  { %v1100_v5 = vpop.f32.mrb[24].mxu1 }
0x19a6   :  { %v1106_v8 = vadd.f32 %v1100_v5, %v955_v63  ;;  %v1834_v6 = vpop.f32.mrb[25].mxu1 }
0x19a7   :  { %v1103_v7 = vpop.f32.mrb[26].mxu1 }
0x19a8   :  { %1952 = vtanh.f32 %v1106_v8  ;;  %v1835_v9 = vpop.f32.mrb[27].mxu1  ;;  %v968_v8 = vadd.f32 %v2377_v4, %v2441_v2 }
0x19b2   :  { %v1953_v10 = vpop.eup %1952 }
0x19b3   :  { %1112 = vrot.lane.b32.xlu1 %v1953_v10, %s1983_s17  ;;  %v1108_v11 = vadd.f32 1.0, %v1953_v10 }
0x19b5   :  { %v1109_v1 = vmul.f32 0.5, %v1108_v11 }
0x19b7   :  { %v1110_v14 = vmul.f32 %v1109_v1, %v2401_v28 }
0x1a25   :  { %v1113_v13 = vpop.permute.xlu1 %1112 }
0x1a26   :  { %v1115_v12 = vmul.f32 %v1113_v13, %v1109_v1 }
0x1a28   :  { %1117 = vrot.lane.b32.xlu0 %v1115_v12, %s1984_s2 }
0x1a9a   :  { %v1118_v15 = vpop.permute.xlu0 %1117 }
0x1a9b   :  { %v1120_v3 = vadd.f32 %v1118_v15, %v1110_v14 }
0x1a9d   :  { %1954 = vtanh.f32 %v1120_v3 }
0x1aa7   :  { %v1955_v60 = vpop.eup %1954 }
0x1aa8   :  { %1123 = vrot.lane.b32.xlu1 %v1955_v60, %s1983_s17 }
0x1b1a   :  { %v1124_v16 = vpop.permute.xlu1 %1123 }
0x1b1b   :  { %v2453_v17 = vmul.f32 %v1124_v16, %v1109_v1 }
0x1b1d   :  { %v1127_v18 = vpack.c.bf16 %v2453_v17, %v2453_v17 }
0x1b1f   :  { %1129 = vrot.lane.b32.xlu0 %v1127_v18, %s1984_s2 }
0x1b91   :  { %v1130_v19 = vpop.permute.xlu0 %1129 }
0x1b92   :  { %1841 = vmatmul.mubr.msk.bf16.vlgmr.msra.gmra.mrb[28].mxu0 %vm140_vm1, %v1130_v19 }
0x1b93   :  { %1853 = vmatpush3.bf16.msra.mxu0 %v2307_v31  ;;  %1856 = vmatprep.mubr.msk.bf16.mxu0 %vm1981_vm0, %v1980_v0 }
0x1b94   :  { %1854 = vmatprep.subr.bf16.mxu0 %v1980_v0 }
0x1b97   :  { %1855 = vmatpush3.bf16.msra.mxu0 %v2316_v34 }
0x1b98   :  { %1868 = vmatprep.subr.bf16.mxu0 %v1980_v0 }
0x1c65   :  { %v1168_v22 = vpop.f32.mrb[28].mxu0 }
0x1c66   :  { %v1174_v23 = vadd.f32 %v1168_v22, %v960_v20  ;;  %v1842_v24 = vpop.f32.mrb[29].mxu0 }
0x1c67   :  { %v1171_v25 = vpop.f32.mrb[30].mxu0 }
0x1c68   :  { %1956 = vtanh.f32 %v1174_v23  ;;  %v1843_v27 = vpop.f32.mrb[31].mxu0  ;;  %v971_v23 = vadd.f32 %v2377_v4, %v2445_v62 }
0x1c72   :  { %v1957_v28 = vpop.eup %1956 }
0x1c73   :  { %1180 = vrot.lane.b32.xlu1 %v1957_v28, %s1983_s17  ;;  %v1176_v29 = vadd.f32 1.0, %v1957_v28 }
0x1c75   :  { %v1177_v30 = vmul.f32 0.5, %v1176_v29 }
0x1c77   :  { %v1178_v32 = vmul.f32 %v1177_v30, %v1120_v3 }
0x1ce5   :  { %v1181_v58 = vpop.permute.xlu1 %1180 }
0x1ce6   :  { %v1183_v21 = vmul.f32 %v1181_v58, %v1177_v30 }
0x1ce8   :  { %1185 = vrot.lane.b32.xlu0 %v1183_v21, %s1984_s2 }
0x1d5a   :  { %v1186_v33 = vpop.permute.xlu0 %1185 }
0x1d5b   :  { %v1188_v36 = vadd.f32 %v1186_v33, %v1178_v32 }
0x1d5d   :  { %1958 = vtanh.f32 %v1188_v36 }
0x1d67   :  { %v1959_v56 = vpop.eup %1958 }
0x1d68   :  { %1191 = vrot.lane.b32.xlu1 %v1959_v56, %s1983_s17 }
0x1dda   :  { %v1192_v37 = vpop.permute.xlu1 %1191 }
0x1ddb   :  { %v2470_v38 = vmul.f32 %v1192_v37, %v1177_v30 }
0x1ddd   :  { %v1195_v40 = vpack.c.bf16 %v2470_v38, %v2470_v38 }
0x1ddf   :  { %1197 = vrot.lane.b32.xlu0 %v1195_v40, %s1984_s2 }
0x1e51   :  { %v1198_v41 = vpop.permute.xlu0 %1197 }
0x1e52   :  { %1849 = vmatmul.mubr.msk.bf16.vlgmr.msra.gmra.mrb[28].mxu1 %vm140_vm1, %v1198_v41  ;;  %v976_v41 = vadd.f32 %v2439_v35, %v2377_v4 }
0x1e53   :  { %1861 = vmatpush3.bf16.msra.mxu1 %v2307_v31  ;;  %1864 = vmatprep.mubr.msk.bf16.mxu1 %vm1981_vm0, %v1980_v0 }
0x1e54   :  { %1862 = vmatprep.subr.bf16.mxu1 %v1980_v0 }
0x1e57   :  { %1863 = vmatpush3.bf16.msra.mxu1 %v2316_v34 }
0x1e58   :  { %1876 = vmatprep.subr.bf16.mxu1 %v1980_v0 }
0x1f25   :  { %v1236_v43 = vpop.f32.mrb[28].mxu1 }
0x1f26   :  { %v1242_v44 = vadd.f32 %v1236_v43, %v963_v42  ;;  %v1850_v45 = vpop.f32.mrb[29].mxu1 }
0x1f27   :  { %v1239_v46 = vpop.f32.mrb[30].mxu1 }
0x1f28   :  { %1960 = vtanh.f32 %v1242_v44  ;;  %v1851_v26 = vpop.f32.mrb[31].mxu1 }
0x1f32   :  { %v1961_v47 = vpop.eup %1960 }
0x1f33   :  { %1248 = vrot.lane.b32.xlu1 %v1961_v47, %s1983_s17  ;;  %v1244_v49 = vadd.f32 1.0, %v1961_v47 }
0x1f35   :  { %v1245_v50 = vmul.f32 0.5, %v1244_v49 }
0x1f37   :  { %v1246_v52 = vmul.f32 %v1245_v50, %v1188_v36 }
0x1fa5   :  { %v1249_v48 = vpop.permute.xlu1 %1248 }
0x1fa6   :  { %v1251_v51 = vmul.f32 %v1249_v48, %v1245_v50 }
0x1fa8   :  { %1253 = vrot.lane.b32.xlu0 %v1251_v51, %s1984_s2 }
0x201a   :  { %v1254_v53 = vpop.permute.xlu0 %1253 }
0x201b   :  { %v1256_v54 = vadd.f32 %v1254_v53, %v1246_v52 }
0x201d   :  { %1962 = vtanh.f32 %v1256_v54 }
0x2027   :  { %v1963_v59 = vpop.eup %1962 }
0x2028   :  { %1259 = vrot.lane.b32.xlu1 %v1963_v59, %s1983_s17 }
0x209a   :  { %v1260_v55 = vpop.permute.xlu1 %1259 }
0x209b   :  { %v2487_v57 = vmul.f32 %v1260_v55, %v1245_v50 }
0x209d   :  { %v1263_v63 = vpack.c.bf16 %v2487_v57, %v2487_v57 }
0x209f   :  { %1265 = vrot.lane.b32.xlu0 %v1263_v63, %s1984_s2 }
0x2111   :  { %v1266_v5 = vpop.permute.xlu0 %1265 }
0x2112   :  { %1857 = vmatmul.mubr.msk.bf16.vlgmr.msra.gmra.mrb[32].mxu0 %vm140_vm1, %v1266_v5  ;;  %v979_v5 = vadd.f32 %v2443_v61, %v2377_v4 }
0x2113   :  { %1869 = vmatpush3.bf16.msra.mxu0 %v2307_v31  ;;  %1872 = vmatprep.mubr.msk.bf16.mxu0 %vm1981_vm0, %v1980_v0 }
0x2114   :  { %1870 = vmatprep.subr.bf16.mxu0 %v1980_v0 }
0x2117   :  { %1871 = vmatpush3.bf16.msra.mxu0 %v2316_v34 }
0x21e5   :  { %v1304_v6 = vpop.f32.mrb[32].mxu0 }
0x21e6   :  { %v1310_v7 = vadd.f32 %v1304_v6, %v968_v8  ;;  %v1858_v9 = vpop.f32.mrb[33].mxu0 }
0x21e7   :  { %v1307_v10 = vpop.f32.mrb[34].mxu0 }
0x21e8   :  { %1964 = vtanh.f32 %v1310_v7  ;;  %v1859_v11 = vpop.f32.mrb[35].mxu0 }
0x21f2   :  { %v1965_v1 = vpop.eup %1964 }
0x21f3   :  { %1316 = vrot.lane.b32.xlu1 %v1965_v1, %s1983_s17  ;;  %v1312_v13 = vadd.f32 1.0, %v1965_v1 }
0x21f5   :  { %v1313_v12 = vmul.f32 0.5, %v1312_v13 }
0x21f7   :  { %v1314_v3 = vmul.f32 %v1313_v12, %v1256_v54 }
0x2265   :  { %v1317_v14 = vpop.permute.xlu1 %1316 }
0x2266   :  { %v1319_v15 = vmul.f32 %v1317_v14, %v1313_v12 }
0x2268   :  { %1321 = vrot.lane.b32.xlu0 %v1319_v15, %s1984_s2  ;;  %v1673_v15 = vld [vmem:[%s2603_s10] ss:$0 sm:$0xff] }
0x22da   :  { %v1322_v60 = vpop.permute.xlu0 %1321 }
0x22db   :  { %v1324_v16 = vadd.f32 %v1322_v60, %v1314_v3 }
0x22dd   :  { %1966 = vtanh.f32 %v1324_v16 }
0x22e7   :  { %v1967_v2 = vpop.eup %1966 }
0x22e8   :  { %1327 = vrot.lane.b32.xlu1 %v1967_v2, %s1983_s17 }
0x235a   :  { %v1328_v18 = vpop.permute.xlu1 %1327 }
0x235b   :  { %v2503_v19 = vmul.f32 %v1328_v18, %v1313_v12 }
0x235d   :  { %v1331_v20 = vpack.c.bf16 %v2503_v19, %v2503_v19 }
0x235f   :  { %1333 = vrot.lane.b32.xlu0 %v1331_v20, %s1984_s2 }
0x23d1   :  { %v1334_v22 = vpop.permute.xlu0 %1333 }
0x23d2   :  { %1865 = vmatmul.mubr.msk.bf16.vlgmr.msra.gmra.mrb[32].mxu1 %vm140_vm1, %v1334_v22 }
0x23d3   :  { %1877 = vmatpush3.bf16.msra.mxu1 %v2307_v31  ;;  %1880 = vmatprep.mubr.msk.bf16.mxu1 %vm1981_vm0, %v1980_v0 }
0x23d4   :  { %1878 = vmatprep.subr.bf16.mxu1 %v1980_v0 }
0x23d7   :  { %1879 = vmatpush3.bf16.msra.mxu1 %v2316_v34 }
0x24a5   :  { %v1372_v24 = vpop.f32.mrb[32].mxu1 }
0x24a6   :  { %v1378_v25 = vadd.f32 %v1372_v24, %v971_v23  ;;  %v1866_v27 = vpop.f32.mrb[33].mxu1  ;;  %v19_v24 = vstv %s2604_s11 }
0x24a7   :  { %v1375_v28 = vpop.f32.mrb[34].mxu1  ;;  %20 = vst [vmem:[#allocation2] sm:$0x1] %v19_v24 }
0x24a8   :  { %1968 = vtanh.f32 %v1378_v25  ;;  %v1867_v29 = vpop.f32.mrb[35].mxu1 }
0x24b2   :  { %v1969_v30 = vpop.eup %1968 }
0x24b3   :  { %1384 = vrot.lane.b32.xlu1 %v1969_v30, %s1983_s17  ;;  %v1380_v31 = vadd.f32 1.0, %v1969_v30 }
0x24b5   :  { %v1381_v58 = vmul.f32 0.5, %v1380_v31 }
0x24b7   :  { %v1382_v0 = vmul.f32 %v1381_v58, %v1324_v16 }
0x2525   :  { %v1385_v21 = vpop.permute.xlu1 %1384 }
0x2526   :  { %v1387_v32 = vmul.f32 %v1385_v21, %v1381_v58 }
0x2528   :  { %1389 = vrot.lane.b32.xlu0 %v1387_v32, %s1984_s2 }
0x259a   :  { %v1390_v34 = vpop.permute.xlu0 %1389 }
0x259b   :  { %v1392_v33 = vadd.f32 %v1390_v34, %v1382_v0 }
0x259d   :  { %1970 = vtanh.f32 %v1392_v33 }
0x25a7   :  { %v1971_v62 = vpop.eup %1970 }
0x25a8   :  { %1395 = vrot.lane.b32.xlu1 %v1971_v62, %s1983_s17 }
0x261a   :  { %v1396_v36 = vpop.permute.xlu1 %1395 }
0x261b   :  { %v1398_v56 = vmul.f32 %v1396_v36, %v1381_v58 }
0x261d   :  { %v1399_v37 = vpack.c.bf16 %v1398_v56, %v1398_v56 }
0x261f   :  { %1401 = vrot.lane.b32.xlu0 %v1399_v37, %s1984_s2 }
0x2691   :  { %v1402_v40 = vpop.permute.xlu0 %1401 }
0x2692   :  { %1873 = vmatmul.mubr.msk.bf16.vlgmr.msra.gmra.mrb[36].mxu0 %vm140_vm1, %v1402_v40  ;;  %v1674_v40 = vld [vmem:[#allocation2] ss:$0 sm:$0xff] }
0x2765   :  { %v1440_v42 = vpop.f32.mrb[36].mxu0 }
0x2766   :  { %v1446_v43 = vadd.f32 %v1440_v42, %v976_v41  ;;  %v1874_v44 = vpop.f32.mrb[37].mxu0 }
0x2767   :  { %v1443_v45 = vpop.f32.mrb[38].mxu0 }
0x2768   :  { %1972 = vtanh.f32 %v1446_v43  ;;  %v1875_v46 = vpop.f32.mrb[39].mxu0 }
0x2772   :  { %v1973_v26 = vpop.eup %1972 }
0x2773   :  { %1452 = vrot.lane.b32.xlu1 %v1973_v26, %s1983_s17  ;;  %v1448_v47 = vadd.f32 1.0, %v1973_v26 }
0x2775   :  { %v1449_v49 = vmul.f32 0.5, %v1448_v47 }
0x2777   :  { %v1450_v51 = vmul.f32 %v1449_v49, %v1392_v33 }
0x27e5   :  { %v1453_v50 = vpop.permute.xlu1 %1452 }
0x27e6   :  { %v1455_v48 = vmul.f32 %v1453_v50, %v1449_v49 }
0x27e8   :  { %1457 = vrot.lane.b32.xlu0 %v1455_v48, %s1984_s2 }
0x285a   :  { %v1458_v52 = vpop.permute.xlu0 %1457 }
0x285b   :  { %v1460_v53 = vadd.f32 %v1458_v52, %v1450_v51 }
0x285d   :  { %1974 = vtanh.f32 %v1460_v53 }
0x2867   :  { %v1975_v35 = vpop.eup %1974 }
0x2868   :  { %1463 = vrot.lane.b32.xlu1 %v1975_v35, %s1983_s17 }
0x28da   :  { %v1464_v54 = vpop.permute.xlu1 %1463 }
0x28db   :  { %v1466_v59 = vmul.f32 %v1464_v54, %v1449_v49 }
0x28dd   :  { %v1467_v55 = vpack.c.bf16 %v1466_v59, %v1466_v59 }
0x28df   :  { %1469 = vrot.lane.b32.xlu0 %v1467_v55, %s1984_s2 }
0x2951   :  { %v1470_v63 = vpop.permute.xlu0 %1469 }
0x2952   :  { %1881 = vmatmul.mubr.msk.bf16.vlgmr.msra.gmra.mrb[36].mxu1 %vm140_vm1, %v1470_v63 }
0x2a25   :  { %v1508_v8 = vpop.f32.mrb[36].mxu1 }
0x2a26   :  { %v1514_v6 = vadd.f32 %v1508_v8, %v979_v5  ;;  %v1882_v7 = vpop.f32.mrb[37].mxu1 }
0x2a27   :  { %v1511_v9 = vpop.f32.mrb[38].mxu1 }
0x2a28   :  { %1976 = vtanh.f32 %v1514_v6  ;;  %v1883_v10 = vpop.f32.mrb[39].mxu1 }
0x2a32   :  { %v1977_v11 = vpop.eup %1976 }
0x2a33   :  { %1520 = vrot.lane.b32.xlu1 %v1977_v11, %s1983_s17  ;;  %v1516_v1 = vadd.f32 1.0, %v1977_v11 }
0x2a35   :  { %v1517_v13 = vmul.f32 0.5, %v1516_v1 }
0x2a37   :  { %v1518_v4 = vmul.f32 %v1517_v13, %v1460_v53 }
0x2aa5   :  { %v1521_v12 = vpop.permute.xlu1 %1520 }
0x2aa6   :  { %v1523_v14 = vmul.f32 %v1521_v12, %v1517_v13 }
0x2aa8   :  { %1525 = vrot.lane.b32.xlu0 %v1523_v14, %s1984_s2 }
0x2aac   :  { %1541 = vrot.lane.b32.xlu0 %v1673_v15, %s1986_s14 }
0x2b1a   :  { %v1526_v61 = vpop.permute.xlu0 %1525 }
0x2b1b   :  { %v1528_v3 = vadd.f32 %v1526_v61, %v1518_v4 }
0x2b1d   :  { %1978 = vtanh.f32 %v1528_v3 }
0x2b1e   :  { %v1542_v60 = vpop.permute.xlu0 %1541 }
0x2b1f   :  { %v1545_v16 = vmul.f32 %v1542_v60, %v2453_v17  ;;  %v1547_v2 = vmul.f32 %v1542_v60, %v2487_v57  ;;  %v1549_v20 = vmul.f32 %v1542_v60, %v1398_v56  ;;  %v1544_v22 = vmul.f32 %v1542_v60, %v2411_v39 }
0x2b20   :  { %v1546_v23 = vmul.f32 %v1542_v60, %v2470_v38  ;;  %v1548_v17 = vmul.f32 %v1542_v60, %v2503_v19  ;;  %v1550_v57 = vmul.f32 %v1542_v60, %v1466_v59 }
0x2b21   :  { %1562 = vrot.lane.b32.xlu0 %v1545_v16, %s1984_s2 }
0x2b25   :  { %1566 = vrot.lane.b32.xlu0 %v1547_v2, %s1984_s2 }
0x2b27   :  { %v1979_v18 = vpop.eup %1978 }
0x2b28   :  { %1531 = vrot.lane.b32.xlu1 %v1979_v18, %s1983_s17 }
0x2b29   :  { %1570 = vrot.lane.b32.xlu0 %v1549_v20, %s1984_s2 }
0x2b2c   :  { %1560 = vrot.lane.b32.xlu1 %v1544_v22, %s1984_s2 }
0x2b30   :  { %1564 = vrot.lane.b32.xlu1 %v1546_v23, %s1984_s2 }
0x2b34   :  { %1568 = vrot.lane.b32.xlu1 %v1548_v17, %s1984_s2 }
0x2b38   :  { %1572 = vrot.lane.b32.xlu1 %v1550_v57, %s1984_s2 }
0x2b93   :  { %v1563_v25 = vpop.permute.xlu0 %1562 }
0x2b94   :  { %v1587_v32 = vsel %vm140_vm1, %v1563_v25, 0.0 }
0x2b97   :  { %v1567_v29 = vpop.permute.xlu0 %1566 }
0x2b98   :  { %v1593_v30 = vsel %vm140_vm1, %v1567_v29, 0.0 }
0x2b9a   :  { %v1532_v39 = vpop.permute.xlu1 %1531 }
0x2b9b   :  { %v1534_v27 = vmul.f32 %v1532_v39, %v1517_v13  ;;  %v1571_v31 = vpop.permute.xlu0 %1570 }
0x2b9c   :  { %v1599_v58 = vsel %vm140_vm1, %v1571_v31, 0.0 }
0x2b9d   :  { %v1551_v28 = vmul.f32 %v1542_v60, %v1534_v27 }
0x2b9e   :  { %v1561_v38 = vpop.permute.xlu1 %1560 }
0x2b9f   :  { %1574 = vrot.lane.b32.xlu0 %v1551_v28, %s1984_s2  ;;  %v1584_v19 = vsel %vm140_vm1, %v1561_v38, 0.0 }
0x2ba0   :  { %1585 = vadd.xlane.f32.xlu1 %v1584_v19 }
0x2ba2   :  { %v1565_v21 = vpop.permute.xlu1 %1564 }
0x2ba3   :  { %v1590_v34 = vsel %vm140_vm1, %v1565_v21, 0.0 }
0x2ba4   :  { %1594 = vadd.xlane.f32.xlu1 %v1593_v30 }
0x2ba6   :  { %v1569_v0 = vpop.permute.xlu1 %1568 }
0x2ba7   :  { %v1596_v33 = vsel %vm140_vm1, %v1569_v0, 0.0 }
0x2ba8   :  { %1600 = vadd.xlane.f32.xlu1 %v1599_v58 }
0x2baa   :  { %v1573_v62 = vpop.permute.xlu1 %1572 }
0x2bab   :  { %v1602_v36 = vsel %vm140_vm1, %v1573_v62, 0.0 }
0x2bbe   :  { %1588 = vadd.xlane.f32.xlu0 %v1587_v32 }
0x2bc2   :  { %1591 = vadd.xlane.f32.xlu0 %v1590_v34 }
0x2bc6   :  { %1597 = vadd.xlane.f32.xlu0 %v1596_v33 }
0x2bca   :  { %1603 = vadd.xlane.f32.xlu0 %v1602_v36 }
0x2c11   :  { %v1575_v56 = vpop.permute.xlu0 %1574 }
0x2c12   :  { %v1605_v37 = vsel %vm140_vm1, %v1575_v56, 0.0 }
0x2c13   :  { %1606 = vadd.xlane.f32.xlu1 %v1605_v37 }
0x2c2d   :  { %v1586_v41 = vpop.xlane.xlu1 %1585 }
0x2c2e   :  { %v1615_v42 = vadd.f32 %v1674_v40, %v1586_v41 }
0x2c30   :  { %1624 = vst.msk [vmem:[%s2605_s12] sm:$0xff] %vm1623_vm3, %v1615_v42 }
0x2c31   :  { %v1595_v43 = vpop.xlane.xlu1 %1594 }
0x2c32   :  { %v1618_v44 = vadd.f32 %v1674_v40, %v1595_v43 }
0x2c34   :  { %1627 = vst.msk [vmem:[%s2605_s12 + $0x18] sm:$0xff] %vm1623_vm3, %v1618_v44 }
0x2c35   :  { %v1601_v45 = vpop.xlane.xlu1 %1600 }
0x2c36   :  { %v1620_v46 = vadd.f32 %v1674_v40, %v1601_v45 }
0x2c38   :  { %1629 = vst.msk [vmem:[%s2605_s12 + $0x28] sm:$0xff] %vm1623_vm3, %v1620_v46 }
0x2c4b   :  { %v1589_v26 = vpop.xlane.xlu0 %1588 }
0x2c4c   :  { %v1616_v47 = vadd.f32 %v1674_v40, %v1589_v26 }
0x2c4e   :  { %1625 = vst.msk [vmem:[%s2605_s12 + $0x8] sm:$0xff] %vm1623_vm3, %v1616_v47 }
0x2c4f   :  { %v1592_v49 = vpop.xlane.xlu0 %1591 }
0x2c50   :  { %v1617_v50 = vadd.f32 %v1674_v40, %v1592_v49 }
0x2c52   :  { %1626 = vst.msk [vmem:[%s2605_s12 + $0x10] sm:$0xff] %vm1623_vm3, %v1617_v50 }
0x2c53   :  { %v1598_v48 = vpop.xlane.xlu0 %1597 }
0x2c54   :  { %v1619_v51 = vadd.f32 %v1674_v40, %v1598_v48 }
0x2c56   :  { %1628 = vst.msk [vmem:[%s2605_s12 + $0x20] sm:$0xff] %vm1623_vm3, %v1619_v51 }
0x2c57   :  { %v1604_v52 = vpop.xlane.xlu0 %1603 }
0x2c58   :  { %v1621_v53 = vadd.f32 %v1674_v40, %v1604_v52 }
0x2c5a   :  { %1630 = vst.msk [vmem:[%s2605_s12 + $0x30] sm:$0xff] %vm1623_vm3, %v1621_v53 }
0x2ca0   :  { %v1607_v35 = vpop.xlane.xlu1 %1606 }
0x2ca1   :  { %v1622_v54 = vadd.f32 %v1674_v40, %v1607_v35 }
0x2ca3   :  { %1631 = vst.msk [vmem:[%s2605_s12 + $0x38] sm:$0xff] %vm1623_vm3, %v1622_v54 }

</bundles_post_ra>
